<compile_context>
chip_gen: v7x
topology: tpu7x:2x2x1
jax: 0.10.0
libtpu: 0.0.40
codegen_flags: <defaults>
</compile_context>

<pallas_src>
import jax
import jax.numpy as jnp
from jax.experimental import pallas as pl
from jax.experimental.pallas import tpu as pltpu

LANE = 128  # hidden / class dims are zero-padded to the TPU lane width

VMEM_SPEC = pl.BlockSpec(memory_space=pltpu.MemorySpace.VMEM)


# ----------------------------- in-kernel helpers -----------------------------

def _gru_cell(xp, h, whh, bhh):
    """Fused-gate GRU cell (PyTorch gate order r, z, n); all-f32 recurrence.

    xp : (1, 3H) f32 precomputed input projection (x @ Wih + bih)
    h  : (1, H)  f32 previous hidden state
    whh: (H, 3H) f32 recurrent weights; bhh: (1, 3H) f32 recurrent bias
    """
    hd = h.shape[1]
    hproj = jnp.dot(h, whh, preferred_element_type=jnp.float32) + bhh
    r = jax.nn.sigmoid(xp[:, 0:hd] + hproj[:, 0:hd])
    z = jax.nn.sigmoid(xp[:, hd:2 * hd] + hproj[:, hd:2 * hd])
    n = jnp.tanh(xp[:, 2 * hd:3 * hd] + r * hproj[:, 2 * hd:3 * hd])
    return (1.0 - z) * n + z * h


def _encode_ctx(emb, mask, w_bf16, b):
    """Synthetic CLS encoder: masked mean pool (as an MXU matmul) -> linear -> tanh.
    emb: (L, H) bf16, mask: (1, L) f32 -> (1, H) f32.  Exact divide."""
    denom = jnp.maximum(jnp.sum(mask, axis=1, keepdims=True), 1.0)
    pooled = jnp.dot(mask.astype(jnp.bfloat16), emb,
                     preferred_element_type=jnp.float32) / denom
    return jnp.tanh(jnp.dot(pooled.astype(jnp.bfloat16), w_bf16,
                            preferred_element_type=jnp.float32) + b)


def _encode_spk(emb, mask, w_bf16, b):
    """Batched masked mean pool (batched MXU matmul, no cross-sublane reduce)
    -> linear -> tanh.  emb: (T, L, H) bf16, mask: (T, L) f32 -> (T, H) f32."""
    t, _, hp = emb.shape
    denom = jnp.maximum(jnp.sum(mask, axis=1, keepdims=True), 1.0)        # (T, 1)
    pooled = jnp.einsum("tql,tlh->tqh", mask.astype(jnp.bfloat16)[:, None, :],
                        emb, preferred_element_type=jnp.float32)
    pooled = pooled.reshape(t, hp) / denom                                 # (T, H)
    return jnp.tanh(jnp.dot(pooled.astype(jnp.bfloat16), w_bf16,
                            preferred_element_type=jnp.float32) + b)


def _gru_2layer(x, valid_len, gru_refs, xp_ref, hseq_ref):
    """Two stacked GRU layers over x (T, H) f32, returning the last layer-2 h.

    Layer-1 recurrence writes its hidden sequence to hseq_ref; the inter-layer
    projection is ONE batched (T, 3H) matmul; the layer-2 recurrence then
    overwrites hseq_ref with its own hidden sequence (used by the classifier
    in the conversation head).  If valid_len is not None the hidden state is
    frozen for steps t >= valid_len, so the returned state matches the GRU run
    on the unpadded history (and stays zero for an empty history, matching the
    torch zeros branch).  Loops are fully unrolled (static trip counts).
    """
    (wih1_ref, whh1_ref, bih1_ref, bhh1_ref,
     wih2_ref, whh2_ref, bih2_ref, bhh2_ref) = gru_refs
    t_steps, hp = x.shape

    def recur(whh_ref, bhh_ref):
        whh = whh_ref[...]          # hoisted out of the unrolled loop
        bhh = bhh_ref[...]
        h = jnp.zeros((1, hp), jnp.float32)
        for t in range(t_steps):    # fully unrolled: static indices, LLO-visible
            h_new = _gru_cell(xp_ref[pl.ds(t, 1), :], h, whh, bhh)
            h = h_new if valid_len is None else jnp.where(t < valid_len, h_new, h)
            hseq_ref[pl.ds(t, 1), :] = h
        return h

    # layer 1: batched input projection, then recurrence -> hseq_ref
    xp_ref[...] = (jnp.dot(x.astype(jnp.bfloat16), wih1_ref[...],
                           preferred_element_type=jnp.float32) + bih1_ref[...])
    recur(whh1_ref, bhh1_ref)

    # layer 2: ONE batched inter-layer projection, then recurrence
    xp_ref[...] = (jnp.dot(hseq_ref[...].astype(jnp.bfloat16), wih2_ref[...],
                           preferred_element_type=jnp.float32) + bih2_ref[...])
    return recur(whh2_ref, bhh2_ref)


# ----------------------------- Pallas kernels -----------------------------

def compm_step_kernel(slen_ref,
                      ctx_emb_ref, ctx_mask_ref, spk_emb_ref, spk_mask_ref,
                      cw_ref, cb_ref, sw_ref, sb_ref,
                      wih1_ref, whh1_ref, bih1_ref, bhh1_ref,
                      wih2_ref, whh2_ref, bih2_ref, bhh2_ref,
                      out_ref, xp_ref, hseq_ref):
    """One CoMPM utterance step per grid index (attention == 'none'):
         ctx_cls = encode(context tokens)                          (1, H)
         spk_cls = encode(speaker-history tokens)                  (T, H)
         track   = last REAL hidden of 2-layer GRU over spk_cls    (1, H)
         out     = ctx_cls + track
    """
    i = pl.program_id(0)
    t_act = slen_ref[i]   # true speaker-history length for this utterance (SMEM)

    ctx_cls = _encode_ctx(ctx_emb_ref[0], ctx_mask_ref[0],
                          cw_ref[...], cb_ref[...])                    # (1, H)
    spk_cls = _encode_spk(spk_emb_ref[0], spk_mask_ref[0],
                          sw_ref[...], sb_ref[...])                    # (T, H)

    track = _gru_2layer(spk_cls, t_act,
                        (wih1_ref, whh1_ref, bih1_ref, bhh1_ref,
                         wih2_ref, whh2_ref, bih2_ref, bhh2_ref),
                        xp_ref, hseq_ref)                              # (1, H)

    out_ref[0] = ctx_cls + track


def conv_head_kernel(x_ref,
                     wih1_ref, whh1_ref, bih1_ref, bhh1_ref,
                     wih2_ref, whh2_ref, bih2_ref, bhh2_ref,
                     ww_ref, wb_ref,
                     logit_ref, xp_ref, hseq_ref):
    """conversationGRU (2-layer, batch=1, batch_first) over the N utterance
    vectors, fused with the classifier: logits = GRU(x)_states @ W + b."""
    _gru_2layer(x_ref[...], None,
                (wih1_ref, whh1_ref, bih1_ref, bhh1_ref,
                 wih2_ref, whh2_ref, bih2_ref, bhh2_ref),
                xp_ref, hseq_ref)
    # hseq_ref now holds the layer-2 hidden sequence: one lane-dense matmul.
    logit_ref[...] = (jnp.dot(hseq_ref[...].astype(jnp.bfloat16), ww_ref[...],
                              preferred_element_type=jnp.float32) + wb_ref[...])


# ----------------------------- pallas_call wrappers -----------------------------

def run_step_batch(ctx_emb, ctx_mask, spk_emb, spk_mask, spk_len, params):
    n, lc, hp = ctx_emb.shape
    _, t_max, ls, _ = spk_emb.shape
    weights = (params["ctx_w"], params["ctx_b"], params["spk_w"], params["spk_b"],
               *params["sgru"])

    def resident(w):
        # grid-invariant BlockSpec: DMA'd to VMEM once, resident across the grid
        return pl.BlockSpec(w.shape, lambda i, slen, _nd=w.ndim: (0,) * _nd)

    grid_spec = pltpu.PrefetchScalarGridSpec(
        num_scalar_prefetch=1,                 # spk_len -> SMEM
        grid=(n,),
        in_specs=[
            pl.BlockSpec((1, lc, hp), lambda i, slen: (i, 0, 0)),
            pl.BlockSpec((1, 1, lc), lambda i, slen: (i, 0, 0)),
            pl.BlockSpec((1, t_max, ls, hp), lambda i, slen: (i, 0, 0, 0)),
            pl.BlockSpec((1, t_max, ls), lambda i, slen: (i, 0, 0)),
            *[resident(w) for w in weights],
        ],
        out_specs=pl.BlockSpec((1, 1, hp), lambda i, slen: (i, 0, 0)),
        scratch_shapes=[pltpu.VMEM((t_max, 3 * hp), jnp.float32),   # xp (reused)
                        pltpu.VMEM((t_max, hp), jnp.float32)],      # hidden seq
    )
    return pl.pallas_call(
        compm_step_kernel,
        grid_spec=grid_spec,
        out_shape=jax.ShapeDtypeStruct((n, 1, hp), jnp.float32),
        compiler_params=pltpu.CompilerParams(
            dimension_semantics=("parallel",)),   # v7x: shard utterances over 2 TCs
    )(spk_len, ctx_emb, ctx_mask, spk_emb, spk_mask, *weights)


def run_conv_head(x, params):
    n, hp = x.shape
    cp = params["ww"].shape[1]
    args = (x, *params["cgru"], params["ww"], params["wb"])
    return pl.pallas_call(
        conv_head_kernel,
        out_shape=jax.ShapeDtypeStruct((n, cp), jnp.float32),
        in_specs=[VMEM_SPEC] * len(args),
        out_specs=VMEM_SPEC,
        scratch_shapes=[pltpu.VMEM((n, 3 * hp), jnp.float32),
                        pltpu.VMEM((n, hp), jnp.float32)],
    )(*args)


def _step_batch_impl(params, ctx_tok, spk_tok, spk_len, pad_token):
    emb = params["emb"]                                                 # (V, HP) bf16
    ctx_emb = jnp.take(emb, ctx_tok, axis=0)                            # (N, Lc, HP)
    ctx_mask = (ctx_tok != pad_token).astype(jnp.float32)[:, None, :]   # (N, 1, Lc)
    spk_emb = jnp.take(emb, spk_tok, axis=0)                            # (N, T, Ls, HP)
    spk_mask = (spk_tok != pad_token).astype(jnp.float32)               # (N, T, Ls)
    out = run_step_batch(ctx_emb, ctx_mask, spk_emb, spk_mask, spk_len, params)
    return out.reshape(out.shape[0], out.shape[2])                      # (N, HP)


def _conv_head_impl(params, utter_vecs, cls_num):
    logits = run_conv_head(utter_vecs, params)                          # (N, 128)
    return logits[:, :cls_num]                                          # (N, clsNum)


_step_batch = jax.jit(_step_batch_impl)
_conv_head = jax.jit(_conv_head_impl, static_argnums=(2,))


# ----------------------------- host-side glue (mirrors model.py) -----------------------------

def padding(ids_list, pad_token_id):
    max_len = max(len(ids) for ids in ids_list)
    return [ids + [pad_token_id] * (max_len - len(ids)) for ids in ids_list]


def _round_up(x, m):
    return ((x + m - 1) // m) * m


def _pad_to(seq, length, pad):
    return list(seq) + [pad] * (length - len(seq))


class CoMPMPallas:
    def __init__(self, clsNum, special_token, cls_token, pad_token, num_emb,
                 hidden=32, attention="none", key=None):
        assert attention == "none"  # TODO(synk): dot/cross/add attention paths not built
        self.clsNum = clsNum
        self.special_token = special_token
        self.cls_token = cls_token
        self.pad_token = pad_token
        self.hiddenDim = hidden

        key = jax.random.PRNGKey(0) if key is None else key
        ks = iter(jax.random.split(key, 64))

        H, HP, CP = hidden, LANE, LANE

        def init(shape, scale=0.1):
            return scale * jax.random.normal(next(ks), shape, dtype=jnp.float32)

        def pad_mat(w, rows, cols):
            return jnp.pad(w, ((0, rows - w.shape[0]), (0, cols - w.shape[1])))

        def init_gru_layer():
            # fused gate layout: columns are [ r | z | n ], each gate lane-padded H->128
            wih = jnp.concatenate([pad_mat(init((H, H)), HP, HP) for _ in range(3)],
                                  axis=1).astype(jnp.bfloat16)          # (HP, 3HP) bf16
            whh = jnp.concatenate([pad_mat(init((H, H)), HP, HP) for _ in range(3)],
                                  axis=1)                               # (HP, 3HP) f32
            bih = jnp.concatenate([pad_mat(init((1, H)), 1, HP) for _ in range(3)],
                                  axis=1)                               # (1, 3HP) f32
            bhh = jnp.concatenate([pad_mat(init((1, H)), 1, HP) for _ in range(3)],
                                  axis=1)                               # (1, 3HP) f32
            return wih, whh, bih, bhh

        self.params = dict(
            # shared token embedding table (stand-in for resized model embeddings)
            emb=pad_mat(init((num_emb, H)), num_emb, HP).astype(jnp.bfloat16),
            # synthetic "context_model" / "speaker_model" CLS-pool encoders
            ctx_w=pad_mat(init((H, H)), HP, HP).astype(jnp.bfloat16),
            ctx_b=pad_mat(init((1, H)), 1, HP),
            spk_w=pad_mat(init((H, H)), HP, HP).astype(jnp.bfloat16),
            spk_b=pad_mat(init((1, H)), 1, HP),
            # 2-layer GRUs (speaker & conversation) with fused-gate layout
            sgru=(*init_gru_layer(), *init_gru_layer()),
            cgru=(*init_gru_layer(), *init_gru_layer()),
            # score head W: Linear(H, clsNum), lane-padded to 128 output columns
            ww=pad_mat(init((H, clsNum)), HP, CP).astype(jnp.bfloat16),
            wb=pad_mat(init((1, clsNum)), 1, CP),
        )

    def forward(self, tokens, speakers, skips):
        # Host-side batching glue (same token bookkeeping as model.py's loop).
        speaker_hist = [[] for _ in range(max(speakers) + 1)]
        ctx_seqs, hist_snapshots = [], []
        for token, speaker, skip in zip(tokens, speakers, skips):
            truncated = token[-511:]
            speaker_hist[speaker].append([self.cls_token] + truncated)
            context = [self.special_token + speaker] + token
            if skip:
                continue
            truncated = context[-511:]
            ctx_seqs.append([self.cls_token] + truncated)
            hist_snapshots.append(list(speaker_hist[speaker]))
        n = len(ctx_seqs)

        # Fixed, batch-padded shapes; true lengths go in as scalar prefetch.
        # TODO(synk): bucket (lc, t_max, ls, n) across forward() calls.
        lc = _round_up(max(len(s) for s in ctx_seqs), 8)
        t_max = max(len(h) for h in hist_snapshots)
        ls = _round_up(max(len(u) for h in hist_snapshots for u in h), 8)

        ctx_tok = jnp.asarray([_pad_to(s, lc, self.pad_token) for s in ctx_seqs],
                              dtype=jnp.int32)                              # (N, Lc)
        spk_rows, spk_len = [], []
        for hist in hist_snapshots:
            rows = [_pad_to(u, ls, self.pad_token) for u in hist]
            rows += [[self.pad_token] * ls] * (t_max - len(hist))
            spk_rows.append(rows)
            spk_len.append(len(hist))
        spk_tok = jnp.asarray(spk_rows, dtype=jnp.int32)                    # (N, T, Ls)
        spk_len = jnp.asarray(spk_len, dtype=jnp.int32)                     # (N,)

        # NOTE: torch's "empty history -> zeros" branch is covered by the
        # length-gated recurrence (spk_len == 0 keeps the track vector at 0).
        utter = _step_batch(self.params, ctx_tok, spk_tok, spk_len,
                            jnp.int32(self.pad_token))                      # (N, 128)
        return _conv_head(self.params, utter, self.clsNum)                  # (N, clsNum)


# ----------------------------- demo -----------------------------

if __name__ == "__main__":
    key = jax.random.PRNGKey(0)
    k_param, k_tok = jax.random.split(key)

    HIDDEN = 32
    CLS_NUM = 4
    NUM_EMB = 64
    SPECIAL_TOKEN = 40
    CLS_TOKEN = 1
    PAD_TOKEN = 0

    model = CoMPMPallas(clsNum=CLS_NUM, special_token=SPECIAL_TOKEN,
                        cls_token=CLS_TOKEN, pad_token=PAD_TOKEN,
                        num_emb=NUM_EMB, hidden=HIDDEN, key=k_param)

    # deterministic synthetic dialogue: 4 utterances, 2 speakers, one skipped
    lengths = [5, 3, 6, 4]
    tokens = []
    for L in lengths:
        k_tok, sub = jax.random.split(k_tok)
        tokens.append([int(t) for t in jax.random.randint(sub, (L,), 2, 40)])
    speakers = [0, 1, 0, 1]
    skips = [0, 0, 1, 0]

    logits = model.forward(tokens, speakers, skips)
    logits = jax.block_until_ready(logits)
    assert logits.shape == (sum(1 for s in skips if not s), CLS_NUM)
    assert bool(jnp.all(jnp.isfinite(logits)))
    print("KERNEL_OK")
</pallas_src>

<mosaic_0001>
module attributes {stable_mosaic.version = 11 : i64} {
  func.func @compm_step_kernel(%arg0: i32, %arg1: memref<3xi32, #tpu.memory_space<smem>>, %arg2: memref<1x8x128xbf16, #tpu.memory_space<vmem>>, %arg3: memref<1x1x8xf32, #tpu.memory_space<vmem>>, %arg4: memref<1x2x8x128xbf16, #tpu.memory_space<vmem>>, %arg5: memref<1x2x8xf32, #tpu.memory_space<vmem>>, %arg6: memref<128x128xbf16, #tpu.memory_space<vmem>>, %arg7: memref<1x128xf32, #tpu.memory_space<vmem>>, %arg8: memref<128x128xbf16, #tpu.memory_space<vmem>>, %arg9: memref<1x128xf32, #tpu.memory_space<vmem>>, %arg10: memref<128x384xbf16, #tpu.memory_space<vmem>>, %arg11: memref<128x384xf32, #tpu.memory_space<vmem>>, %arg12: memref<1x384xf32, #tpu.memory_space<vmem>>, %arg13: memref<1x384xf32, #tpu.memory_space<vmem>>, %arg14: memref<128x384xbf16, #tpu.memory_space<vmem>>, %arg15: memref<128x384xf32, #tpu.memory_space<vmem>>, %arg16: memref<1x384xf32, #tpu.memory_space<vmem>>, %arg17: memref<1x384xf32, #tpu.memory_space<vmem>>, %arg18: memref<1x1x128xf32, #tpu.memory_space<vmem>>, %arg19: memref<2x384xf32, #tpu.memory_space<vmem>>, %arg20: memref<2x128xf32, #tpu.memory_space<vmem>>) attributes {dimension_semantics = [#tpu.dimension_semantics<parallel>], iteration_bounds = array<i64: 3>, scalar_prefetch = 1 : i64, scratch_operands = 2 : i64, tpu.core_type = #tpu.core_type<tc>, window_params = [{transform_indices = @transform_0, window_bounds = array<i64: 1, 8, 128>}, {transform_indices = @transform_1, window_bounds = array<i64: 1, 1, 8>}, {transform_indices = @transform_2, window_bounds = array<i64: 1, 2, 8, 128>}, {transform_indices = @transform_3, window_bounds = array<i64: 1, 2, 8>}, {pipeline_mode = #tpu.pipeline_mode<synchronous>, transform_indices = @transform_4, window_bounds = array<i64: 128, 128>}, {pipeline_mode = #tpu.pipeline_mode<synchronous>, transform_indices = @transform_5, window_bounds = array<i64: 1, 128>}, {pipeline_mode = #tpu.pipeline_mode<synchronous>, transform_indices = @transform_6, window_bounds = array<i64: 128, 128>}, {pipeline_mode = #tpu.pipeline_mode<synchronous>, transform_indices = @transform_7, window_bounds = array<i64: 1, 128>}, {pipeline_mode = #tpu.pipeline_mode<synchronous>, transform_indices = @transform_8, window_bounds = array<i64: 128, 384>}, {pipeline_mode = #tpu.pipeline_mode<synchronous>, transform_indices = @transform_9, window_bounds = array<i64: 128, 384>}, {pipeline_mode = #tpu.pipeline_mode<synchronous>, transform_indices = @transform_10, window_bounds = array<i64: 1, 384>}, {pipeline_mode = #tpu.pipeline_mode<synchronous>, transform_indices = @transform_11, window_bounds = array<i64: 1, 384>}, {pipeline_mode = #tpu.pipeline_mode<synchronous>, transform_indices = @transform_12, window_bounds = array<i64: 128, 384>}, {pipeline_mode = #tpu.pipeline_mode<synchronous>, transform_indices = @transform_13, window_bounds = array<i64: 128, 384>}, {pipeline_mode = #tpu.pipeline_mode<synchronous>, transform_indices = @transform_14, window_bounds = array<i64: 1, 384>}, {pipeline_mode = #tpu.pipeline_mode<synchronous>, transform_indices = @transform_15, window_bounds = array<i64: 1, 384>}, {transform_indices = @transform_16, window_bounds = array<i64: 1, 1, 128>}]} {
    %0 = arith.index_cast %arg0 : i32 to index
    %1 = memref.load %arg1[%0] : memref<3xi32, #tpu.memory_space<smem>>
    %c0 = arith.constant 0 : index
    %c0_0 = arith.constant 0 : index
    %c0_1 = arith.constant 0 : index
    %2 = vector.load %arg2[%c0, %c0_0, %c0_1] : memref<1x8x128xbf16, #tpu.memory_space<vmem>>, vector<1x8x128xbf16>
    %3 = vector.shape_cast %2 : vector<1x8x128xbf16> to vector<8x128xbf16>
    %c0_2 = arith.constant 0 : index
    %c0_3 = arith.constant 0 : index
    %c0_4 = arith.constant 0 : index
    %4 = vector.load %arg3[%c0_2, %c0_3, %c0_4] : memref<1x1x8xf32, #tpu.memory_space<vmem>>, vector<1x1x8xf32>
    %5 = vector.shape_cast %4 : vector<1x1x8xf32> to vector<1x8xf32>
    %c0_5 = arith.constant 0 : index
    %c0_6 = arith.constant 0 : index
    %6 = vector.load %arg6[%c0_5, %c0_6] : memref<128x128xbf16, #tpu.memory_space<vmem>>, vector<128x128xbf16>
    %c0_7 = arith.constant 0 : index
    %c0_8 = arith.constant 0 : index
    %7 = vector.load %arg7[%c0_7, %c0_8] : memref<1x128xf32, #tpu.memory_space<vmem>>, vector<1x128xf32>
    %cst = arith.constant dense<0.000000e+00> : vector<1xf32>
    %8 = vector.multi_reduction <add>, %5, %cst [1] : vector<1x8xf32> to vector<1xf32>
    %9 = vector.shape_cast %8 : vector<1xf32> to vector<1x1xf32>
    %cst_9 = arith.constant 1.000000e+00 : f32
    %10 = vector.broadcast %cst_9 : f32 to vector<1x1xf32>
    %11 = arith.maximumf %9, %10 : vector<1x1xf32>
    %12 = arith.truncf %5 : vector<1x8xf32> to vector<1x8xbf16>
    %cst_10 = arith.constant dense<0.000000e+00> : vector<1x128xf32>
    %13 = tpu.matmul %12, %3, %cst_10 {dimension_numbers = #tpu.dot_dimension_numbers<[1], [0], [0], [1], [0, 0, 1, 1], [], []>} : vector<1x8xbf16>, vector<8x128xbf16>, vector<1x128xf32> -> vector<1x128xf32>
    %14 = vector.broadcast %11 : vector<1x1xf32> to vector<1x128xf32>
    %15 = arith.divf %13, %14 : vector<1x128xf32>
    %16 = arith.truncf %15 : vector<1x128xf32> to vector<1x128xbf16>
    %cst_11 = arith.constant dense<0.000000e+00> : vector<1x128xf32>
    %17 = tpu.matmul %16, %6, %cst_11 {dimension_numbers = #tpu.dot_dimension_numbers<[1], [0], [0], [1], [0, 0, 1, 1], [], []>} : vector<1x128xbf16>, vector<128x128xbf16>, vector<1x128xf32> -> vector<1x128xf32>
    %18 = arith.addf %17, %7 : vector<1x128xf32>
    %19 = math.tanh %18 : vector<1x128xf32>
    %c0_12 = arith.constant 0 : index
    %c0_13 = arith.constant 0 : index
    %c0_14 = arith.constant 0 : index
    %c0_15 = arith.constant 0 : index
    %20 = vector.load %arg4[%c0_12, %c0_13, %c0_14, %c0_15] : memref<1x2x8x128xbf16, #tpu.memory_space<vmem>>, vector<1x2x8x128xbf16>
    %21 = vector.shape_cast %20 : vector<1x2x8x128xbf16> to vector<2x8x128xbf16>
    %c0_16 = arith.constant 0 : index
    %c0_17 = arith.constant 0 : index
    %c0_18 = arith.constant 0 : index
    %22 = vector.load %arg5[%c0_16, %c0_17, %c0_18] : memref<1x2x8xf32, #tpu.memory_space<vmem>>, vector<1x2x8xf32>
    %23 = vector.shape_cast %22 : vector<1x2x8xf32> to vector<2x8xf32>
    %c0_19 = arith.constant 0 : index
    %c0_20 = arith.constant 0 : index
    %24 = vector.load %arg8[%c0_19, %c0_20] : memref<128x128xbf16, #tpu.memory_space<vmem>>, vector<128x128xbf16>
    %c0_21 = arith.constant 0 : index
    %c0_22 = arith.constant 0 : index
    %25 = vector.load %arg9[%c0_21, %c0_22] : memref<1x128xf32, #tpu.memory_space<vmem>>, vector<1x128xf32>
    %cst_23 = arith.constant dense<0.000000e+00> : vector<2xf32>
    %26 = vector.multi_reduction <add>, %23, %cst_23 [1] : vector<2x8xf32> to vector<2xf32>
    %27 = vector.shape_cast %26 : vector<2xf32> to vector<2x1xf32>
    %cst_24 = arith.constant 1.000000e+00 : f32
    %28 = vector.broadcast %cst_24 : f32 to vector<2x1xf32>
    %29 = arith.maximumf %27, %28 : vector<2x1xf32>
    %30 = arith.truncf %23 : vector<2x8xf32> to vector<2x8xbf16>
    %31 = vector.shape_cast %30 : vector<2x8xbf16> to vector<2x1x8xbf16>
    "tpu.trace_start"() <{level = 10 : i32, message = "tql,tlh->tqh"}> : () -> ()
    %cst_25 = arith.constant dense<0.000000e+00> : vector<2x1x128xf32>
    %32 = tpu.matmul %31, %21, %cst_25 {dimension_numbers = #tpu.dot_dimension_numbers<[2], [1], [1], [2], [0, 0, 0, 1, 1, 2], [0], [0]>} : vector<2x1x8xbf16>, vector<2x8x128xbf16>, vector<2x1x128xf32> -> vector<2x1x128xf32>
    "tpu.trace_stop"() : () -> ()
    %33 = vector.shape_cast %32 : vector<2x1x128xf32> to vector<2x128xf32>
    %34 = vector.broadcast %29 : vector<2x1xf32> to vector<2x128xf32>
    %35 = arith.divf %33, %34 : vector<2x128xf32>
    %36 = arith.truncf %35 : vector<2x128xf32> to vector<2x128xbf16>
    %cst_26 = arith.constant dense<0.000000e+00> : vector<2x128xf32>
    %37 = tpu.matmul %36, %24, %cst_26 {dimension_numbers = #tpu.dot_dimension_numbers<[1], [0], [0], [1], [0, 0, 1, 1], [], []>} : vector<2x128xbf16>, vector<128x128xbf16>, vector<2x128xf32> -> vector<2x128xf32>
    %38 = vector.broadcast %25 : vector<1x128xf32> to vector<2x128xf32>
    %39 = arith.addf %37, %38 : vector<2x128xf32>
    %40 = math.tanh %39 : vector<2x128xf32>
    %41 = arith.truncf %40 : vector<2x128xf32> to vector<2x128xbf16>
    %c0_27 = arith.constant 0 : index
    %c0_28 = arith.constant 0 : index
    %42 = vector.load %arg10[%c0_27, %c0_28] : memref<128x384xbf16, #tpu.memory_space<vmem>>, vector<128x384xbf16>
    %cst_29 = arith.constant dense<0.000000e+00> : vector<2x384xf32>
    %43 = tpu.matmul %41, %42, %cst_29 {dimension_numbers = #tpu.dot_dimension_numbers<[1], [0], [0], [1], [0, 0, 1, 1], [], []>} : vector<2x128xbf16>, vector<128x384xbf16>, vector<2x384xf32> -> vector<2x384xf32>
    %c0_30 = arith.constant 0 : index
    %c0_31 = arith.constant 0 : index
    %44 = vector.load %arg12[%c0_30, %c0_31] : memref<1x384xf32, #tpu.memory_space<vmem>>, vector<1x384xf32>
    %45 = vector.broadcast %44 : vector<1x384xf32> to vector<2x384xf32>
    %46 = arith.addf %43, %45 : vector<2x384xf32>
    %c0_32 = arith.constant 0 : index
    %c0_33 = arith.constant 0 : index
    %47 = vector.load %arg19[%c0_32, %c0_33] : memref<2x384xf32, #tpu.memory_space<vmem>>, vector<2x384xf32>
    tpu.vector_store %arg19[%c0_32, %c0_33], %46 {strides = array<i32>} : memref<2x384xf32, #tpu.memory_space<vmem>>, vector<2x384xf32>,
    %c0_34 = arith.constant 0 : index
    %c0_35 = arith.constant 0 : index
    %48 = vector.load %arg11[%c0_34, %c0_35] : memref<128x384xf32, #tpu.memory_space<vmem>>, vector<128x384xf32>
    %c0_36 = arith.constant 0 : index
    %c0_37 = arith.constant 0 : index
    %49 = vector.load %arg13[%c0_36, %c0_37] : memref<1x384xf32, #tpu.memory_space<vmem>>, vector<1x384xf32>
    %cst_38 = arith.constant 0.000000e+00 : f32
    %50 = vector.broadcast %cst_38 : f32 to vector<1x128xf32>
    %c0_39 = arith.constant 0 : index
    %c0_40 = arith.constant 0 : index
    %51 = vector.load %arg19[%c0_39, %c0_40] : memref<2x384xf32, #tpu.memory_space<vmem>>, vector<1x384xf32>
    %cst_41 = arith.constant dense<0.000000e+00> : vector<1x384xf32>
    %52 = tpu.matmul %50, %48, %cst_41 {dimension_numbers = #tpu.dot_dimension_numbers<[1], [0], [0], [1], [0, 0, 1, 1], [], []>} : vector<1x128xf32>, vector<128x384xf32>, vector<1x384xf32> -> vector<1x384xf32>
    %53 = arith.addf %52, %49 : vector<1x384xf32>
    %54 = vector.extract_strided_slice %51 {offsets = [0, 0], sizes = [1, 128], strides = [1, 1]} : vector<1x384xf32> to vector<1x128xf32>
    %55 = vector.extract_strided_slice %53 {offsets = [0, 0], sizes = [1, 128], strides = [1, 1]} : vector<1x384xf32> to vector<1x128xf32>
    %56 = arith.addf %54, %55 : vector<1x128xf32>
    %57 = arith.negf %56 : vector<1x128xf32>
    %58 = math.exp %57 : vector<1x128xf32>
    %cst_42 = arith.constant 1.000000e+00 : f32
    %59 = vector.broadcast %cst_42 : f32 to vector<1x128xf32>
    %60 = arith.addf %59, %58 : vector<1x128xf32>
    %61 = arith.divf %59, %60 : vector<1x128xf32>
    %62 = vector.extract_strided_slice %51 {offsets = [0, 128], sizes = [1, 128], strides = [1, 1]} : vector<1x384xf32> to vector<1x128xf32>
    %63 = vector.extract_strided_slice %53 {offsets = [0, 128], sizes = [1, 128], strides = [1, 1]} : vector<1x384xf32> to vector<1x128xf32>
    %64 = arith.addf %62, %63 : vector<1x128xf32>
    %65 = arith.negf %64 : vector<1x128xf32>
    %66 = math.exp %65 : vector<1x128xf32>
    %cst_43 = arith.constant 1.000000e+00 : f32
    %67 = vector.broadcast %cst_43 : f32 to vector<1x128xf32>
    %68 = arith.addf %67, %66 : vector<1x128xf32>
    %69 = arith.divf %67, %68 : vector<1x128xf32>
    %70 = vector.extract_strided_slice %51 {offsets = [0, 256], sizes = [1, 128], strides = [1, 1]} : vector<1x384xf32> to vector<1x128xf32>
    %71 = vector.extract_strided_slice %53 {offsets = [0, 256], sizes = [1, 128], strides = [1, 1]} : vector<1x384xf32> to vector<1x128xf32>
    %72 = arith.mulf %61, %71 : vector<1x128xf32>
    %73 = arith.addf %70, %72 : vector<1x128xf32>
    %74 = math.tanh %73 : vector<1x128xf32>
    %cst_44 = arith.constant 1.000000e+00 : f32
    %75 = vector.broadcast %cst_44 : f32 to vector<1x128xf32>
    %76 = arith.subf %75, %69 : vector<1x128xf32>
    %77 = arith.mulf %76, %74 : vector<1x128xf32>
    %78 = arith.mulf %69, %50 : vector<1x128xf32>
    %79 = arith.addf %77, %78 : vector<1x128xf32>
    %c0_i32 = arith.constant 0 : i32
    %80 = arith.cmpi sgt, %1, %c0_i32 : i32
    %81 = arith.select %80, %79, %50 : vector<1x128xf32>
    %c0_45 = arith.constant 0 : index
    %c0_46 = arith.constant 0 : index
    %82 = vector.load %arg20[%c0_45, %c0_46] : memref<2x128xf32, #tpu.memory_space<vmem>>, vector<1x128xf32>
    tpu.vector_store %arg20[%c0_45, %c0_46], %81 {strides = array<i32>} : memref<2x128xf32, #tpu.memory_space<vmem>>, vector<1x128xf32>,
    %c1 = arith.constant 1 : index
    %c0_47 = arith.constant 0 : index
    %83 = vector.load %arg19[%c1, %c0_47] : memref<2x384xf32, #tpu.memory_space<vmem>>, vector<1x384xf32>
    %cst_48 = arith.constant dense<0.000000e+00> : vector<1x384xf32>
    %84 = tpu.matmul %81, %48, %cst_48 {dimension_numbers = #tpu.dot_dimension_numbers<[1], [0], [0], [1], [0, 0, 1, 1], [], []>} : vector<1x128xf32>, vector<128x384xf32>, vector<1x384xf32> -> vector<1x384xf32>
    %85 = arith.addf %84, %49 : vector<1x384xf32>
    %86 = vector.extract_strided_slice %83 {offsets = [0, 0], sizes = [1, 128], strides = [1, 1]} : vector<1x384xf32> to vector<1x128xf32>
    %87 = vector.extract_strided_slice %85 {offsets = [0, 0], sizes = [1, 128], strides = [1, 1]} : vector<1x384xf32> to vector<1x128xf32>
    %88 = arith.addf %86, %87 : vector<1x128xf32>
    %89 = arith.negf %88 : vector<1x128xf32>
    %90 = math.exp %89 : vector<1x128xf32>
    %cst_49 = arith.constant 1.000000e+00 : f32
    %91 = vector.broadcast %cst_49 : f32 to vector<1x128xf32>
    %92 = arith.addf %91, %90 : vector<1x128xf32>
    %93 = arith.divf %91, %92 : vector<1x128xf32>
    %94 = vector.extract_strided_slice %83 {offsets = [0, 128], sizes = [1, 128], strides = [1, 1]} : vector<1x384xf32> to vector<1x128xf32>
    %95 = vector.extract_strided_slice %85 {offsets = [0, 128], sizes = [1, 128], strides = [1, 1]} : vector<1x384xf32> to vector<1x128xf32>
    %96 = arith.addf %94, %95 : vector<1x128xf32>
    %97 = arith.negf %96 : vector<1x128xf32>
    %98 = math.exp %97 : vector<1x128xf32>
    %cst_50 = arith.constant 1.000000e+00 : f32
    %99 = vector.broadcast %cst_50 : f32 to vector<1x128xf32>
    %100 = arith.addf %99, %98 : vector<1x128xf32>
    %101 = arith.divf %99, %100 : vector<1x128xf32>
    %102 = vector.extract_strided_slice %83 {offsets = [0, 256], sizes = [1, 128], strides = [1, 1]} : vector<1x384xf32> to vector<1x128xf32>
    %103 = vector.extract_strided_slice %85 {offsets = [0, 256], sizes = [1, 128], strides = [1, 1]} : vector<1x384xf32> to vector<1x128xf32>
    %104 = arith.mulf %93, %103 : vector<1x128xf32>
    %105 = arith.addf %102, %104 : vector<1x128xf32>
    %106 = math.tanh %105 : vector<1x128xf32>
    %cst_51 = arith.constant 1.000000e+00 : f32
    %107 = vector.broadcast %cst_51 : f32 to vector<1x128xf32>
    %108 = arith.subf %107, %101 : vector<1x128xf32>
    %109 = arith.mulf %108, %106 : vector<1x128xf32>
    %110 = arith.mulf %101, %81 : vector<1x128xf32>
    %111 = arith.addf %109, %110 : vector<1x128xf32>
    %c1_i32 = arith.constant 1 : i32
    %112 = arith.cmpi sgt, %1, %c1_i32 : i32
    %113 = arith.select %112, %111, %81 : vector<1x128xf32>
    %c1_52 = arith.constant 1 : index
    %c0_53 = arith.constant 0 : index
    %114 = vector.load %arg20[%c1_52, %c0_53] : memref<2x128xf32, #tpu.memory_space<vmem>>, vector<1x128xf32>
    tpu.vector_store %arg20[%c1_52, %c0_53], %113 {strides = array<i32>} : memref<2x128xf32, #tpu.memory_space<vmem>>, vector<1x128xf32>,
    %c0_54 = arith.constant 0 : index
    %c0_55 = arith.constant 0 : index
    %115 = vector.load %arg20[%c0_54, %c0_55] : memref<2x128xf32, #tpu.memory_space<vmem>>, vector<2x128xf32>
    %116 = arith.truncf %115 : vector<2x128xf32> to vector<2x128xbf16>
    %c0_56 = arith.constant 0 : index
    %c0_57 = arith.constant 0 : index
    %117 = vector.load %arg14[%c0_56, %c0_57] : memref<128x384xbf16, #tpu.memory_space<vmem>>, vector<128x384xbf16>
    %cst_58 = arith.constant dense<0.000000e+00> : vector<2x384xf32>
    %118 = tpu.matmul %116, %117, %cst_58 {dimension_numbers = #tpu.dot_dimension_numbers<[1], [0], [0], [1], [0, 0, 1, 1], [], []>} : vector<2x128xbf16>, vector<128x384xbf16>, vector<2x384xf32> -> vector<2x384xf32>
    %c0_59 = arith.constant 0 : index
    %c0_60 = arith.constant 0 : index
    %119 = vector.load %arg16[%c0_59, %c0_60] : memref<1x384xf32, #tpu.memory_space<vmem>>, vector<1x384xf32>
    %120 = vector.broadcast %119 : vector<1x384xf32> to vector<2x384xf32>
    %121 = arith.addf %118, %120 : vector<2x384xf32>
    %c0_61 = arith.constant 0 : index
    %c0_62 = arith.constant 0 : index
    %122 = vector.load %arg19[%c0_61, %c0_62] : memref<2x384xf32, #tpu.memory_space<vmem>>, vector<2x384xf32>
    tpu.vector_store %arg19[%c0_61, %c0_62], %121 {strides = array<i32>} : memref<2x384xf32, #tpu.memory_space<vmem>>, vector<2x384xf32>,
    %c0_63 = arith.constant 0 : index
    %c0_64 = arith.constant 0 : index
    %123 = vector.load %arg15[%c0_63, %c0_64] : memref<128x384xf32, #tpu.memory_space<vmem>>, vector<128x384xf32>
    %c0_65 = arith.constant 0 : index
    %c0_66 = arith.constant 0 : index
    %124 = vector.load %arg17[%c0_65, %c0_66] : memref<1x384xf32, #tpu.memory_space<vmem>>, vector<1x384xf32>
    %cst_67 = arith.constant 0.000000e+00 : f32
    %125 = vector.broadcast %cst_67 : f32 to vector<1x128xf32>
    %c0_68 = arith.constant 0 : index
    %c0_69 = arith.constant 0 : index
    %126 = vector.load %arg19[%c0_68, %c0_69] : memref<2x384xf32, #tpu.memory_space<vmem>>, vector<1x384xf32>
    %cst_70 = arith.constant dense<0.000000e+00> : vector<1x384xf32>
    %127 = tpu.matmul %125, %123, %cst_70 {dimension_numbers = #tpu.dot_dimension_numbers<[1], [0], [0], [1], [0, 0, 1, 1], [], []>} : vector<1x128xf32>, vector<128x384xf32>, vector<1x384xf32> -> vector<1x384xf32>
    %128 = arith.addf %127, %124 : vector<1x384xf32>
    %129 = vector.extract_strided_slice %126 {offsets = [0, 0], sizes = [1, 128], strides = [1, 1]} : vector<1x384xf32> to vector<1x128xf32>
    %130 = vector.extract_strided_slice %128 {offsets = [0, 0], sizes = [1, 128], strides = [1, 1]} : vector<1x384xf32> to vector<1x128xf32>
    %131 = arith.addf %129, %130 : vector<1x128xf32>
    %132 = arith.negf %131 : vector<1x128xf32>
    %133 = math.exp %132 : vector<1x128xf32>
    %cst_71 = arith.constant 1.000000e+00 : f32
    %134 = vector.broadcast %cst_71 : f32 to vector<1x128xf32>
    %135 = arith.addf %134, %133 : vector<1x128xf32>
    %136 = arith.divf %134, %135 : vector<1x128xf32>
    %137 = vector.extract_strided_slice %126 {offsets = [0, 128], sizes = [1, 128], strides = [1, 1]} : vector<1x384xf32> to vector<1x128xf32>
    %138 = vector.extract_strided_slice %128 {offsets = [0, 128], sizes = [1, 128], strides = [1, 1]} : vector<1x384xf32> to vector<1x128xf32>
    %139 = arith.addf %137, %138 : vector<1x128xf32>
    %140 = arith.negf %139 : vector<1x128xf32>
    %141 = math.exp %140 : vector<1x128xf32>
    %cst_72 = arith.constant 1.000000e+00 : f32
    %142 = vector.broadcast %cst_72 : f32 to vector<1x128xf32>
    %143 = arith.addf %142, %141 : vector<1x128xf32>
    %144 = arith.divf %142, %143 : vector<1x128xf32>
    %145 = vector.extract_strided_slice %126 {offsets = [0, 256], sizes = [1, 128], strides = [1, 1]} : vector<1x384xf32> to vector<1x128xf32>
    %146 = vector.extract_strided_slice %128 {offsets = [0, 256], sizes = [1, 128], strides = [1, 1]} : vector<1x384xf32> to vector<1x128xf32>
    %147 = arith.mulf %136, %146 : vector<1x128xf32>
    %148 = arith.addf %145, %147 : vector<1x128xf32>
    %149 = math.tanh %148 : vector<1x128xf32>
    %cst_73 = arith.constant 1.000000e+00 : f32
    %150 = vector.broadcast %cst_73 : f32 to vector<1x128xf32>
    %151 = arith.subf %150, %144 : vector<1x128xf32>
    %152 = arith.mulf %151, %149 : vector<1x128xf32>
    %153 = arith.mulf %144, %125 : vector<1x128xf32>
    %154 = arith.addf %152, %153 : vector<1x128xf32>
    %c0_i32_74 = arith.constant 0 : i32
    %155 = arith.cmpi sgt, %1, %c0_i32_74 : i32
    %156 = arith.select %155, %154, %125 : vector<1x128xf32>
    %c0_75 = arith.constant 0 : index
    %c0_76 = arith.constant 0 : index
    %157 = vector.load %arg20[%c0_75, %c0_76] : memref<2x128xf32, #tpu.memory_space<vmem>>, vector<1x128xf32>
    tpu.vector_store %arg20[%c0_75, %c0_76], %156 {strides = array<i32>} : memref<2x128xf32, #tpu.memory_space<vmem>>, vector<1x128xf32>,
    %c1_77 = arith.constant 1 : index
    %c0_78 = arith.constant 0 : index
    %158 = vector.load %arg19[%c1_77, %c0_78] : memref<2x384xf32, #tpu.memory_space<vmem>>, vector<1x384xf32>
    %cst_79 = arith.constant dense<0.000000e+00> : vector<1x384xf32>
    %159 = tpu.matmul %156, %123, %cst_79 {dimension_numbers = #tpu.dot_dimension_numbers<[1], [0], [0], [1], [0, 0, 1, 1], [], []>} : vector<1x128xf32>, vector<128x384xf32>, vector<1x384xf32> -> vector<1x384xf32>
    %160 = arith.addf %159, %124 : vector<1x384xf32>
    %161 = vector.extract_strided_slice %158 {offsets = [0, 0], sizes = [1, 128], strides = [1, 1]} : vector<1x384xf32> to vector<1x128xf32>
    %162 = vector.extract_strided_slice %160 {offsets = [0, 0], sizes = [1, 128], strides = [1, 1]} : vector<1x384xf32> to vector<1x128xf32>
    %163 = arith.addf %161, %162 : vector<1x128xf32>
    %164 = arith.negf %163 : vector<1x128xf32>
    %165 = math.exp %164 : vector<1x128xf32>
    %cst_80 = arith.constant 1.000000e+00 : f32
    %166 = vector.broadcast %cst_80 : f32 to vector<1x128xf32>
    %167 = arith.addf %166, %165 : vector<1x128xf32>
    %168 = arith.divf %166, %167 : vector<1x128xf32>
    %169 = vector.extract_strided_slice %158 {offsets = [0, 128], sizes = [1, 128], strides = [1, 1]} : vector<1x384xf32> to vector<1x128xf32>
    %170 = vector.extract_strided_slice %160 {offsets = [0, 128], sizes = [1, 128], strides = [1, 1]} : vector<1x384xf32> to vector<1x128xf32>
    %171 = arith.addf %169, %170 : vector<1x128xf32>
    %172 = arith.negf %171 : vector<1x128xf32>
    %173 = math.exp %172 : vector<1x128xf32>
    %cst_81 = arith.constant 1.000000e+00 : f32
    %174 = vector.broadcast %cst_81 : f32 to vector<1x128xf32>
    %175 = arith.addf %174, %173 : vector<1x128xf32>
    %176 = arith.divf %174, %175 : vector<1x128xf32>
    %177 = vector.extract_strided_slice %158 {offsets = [0, 256], sizes = [1, 128], strides = [1, 1]} : vector<1x384xf32> to vector<1x128xf32>
    %178 = vector.extract_strided_slice %160 {offsets = [0, 256], sizes = [1, 128], strides = [1, 1]} : vector<1x384xf32> to vector<1x128xf32>
    %179 = arith.mulf %168, %178 : vector<1x128xf32>
    %180 = arith.addf %177, %179 : vector<1x128xf32>
    %181 = math.tanh %180 : vector<1x128xf32>
    %cst_82 = arith.constant 1.000000e+00 : f32
    %182 = vector.broadcast %cst_82 : f32 to vector<1x128xf32>
    %183 = arith.subf %182, %176 : vector<1x128xf32>
    %184 = arith.mulf %183, %181 : vector<1x128xf32>
    %185 = arith.mulf %176, %156 : vector<1x128xf32>
    %186 = arith.addf %184, %185 : vector<1x128xf32>
    %c1_i32_83 = arith.constant 1 : i32
    %187 = arith.cmpi sgt, %1, %c1_i32_83 : i32
    %188 = arith.select %187, %186, %156 : vector<1x128xf32>
    %c1_84 = arith.constant 1 : index
    %c0_85 = arith.constant 0 : index
    %189 = vector.load %arg20[%c1_84, %c0_85] : memref<2x128xf32, #tpu.memory_space<vmem>>, vector<1x128xf32>
    tpu.vector_store %arg20[%c1_84, %c0_85], %188 {strides = array<i32>} : memref<2x128xf32, #tpu.memory_space<vmem>>, vector<1x128xf32>,
    %190 = arith.addf %19, %188 : vector<1x128xf32>
    %c0_86 = arith.constant 0 : index
    %c0_87 = arith.constant 0 : index
    %c0_88 = arith.constant 0 : index
    %191 = vector.load %arg18[%c0_86, %c0_87, %c0_88] : memref<1x1x128xf32, #tpu.memory_space<vmem>>, vector<1x1x128xf32>
    %192 = vector.shape_cast %191 : vector<1x1x128xf32> to vector<1x128xf32>
    %193 = vector.shape_cast %190 : vector<1x128xf32> to vector<1x1x128xf32>
    tpu.vector_store %arg18[%c0_86, %c0_87, %c0_88], %193 {strides = array<i32>} : memref<1x1x128xf32, #tpu.memory_space<vmem>>, vector<1x1x128xf32>,
    return
  }
  func.func @transform_0(%arg0: i32, %arg1: memref<3xi32, #tpu.memory_space<smem>>) -> (i32, i32, i32) {
    %c0_i32 = arith.constant 0 : i32
    %c0_i32_0 = arith.constant 0 : i32
    %c0_i32_1 = arith.constant 0 : i32
    return %arg0, %c0_i32, %c0_i32_0 : i32, i32, i32
  }
  func.func @transform_1(%arg0: i32, %arg1: memref<3xi32, #tpu.memory_space<smem>>) -> (i32, i32, i32) {
    %c0_i32 = arith.constant 0 : i32
    %c0_i32_0 = arith.constant 0 : i32
    %c0_i32_1 = arith.constant 0 : i32
    return %arg0, %c0_i32, %c0_i32_0 : i32, i32, i32
  }
  func.func @transform_2(%arg0: i32, %arg1: memref<3xi32, #tpu.memory_space<smem>>) -> (i32, i32, i32, i32) {
    %c0_i32 = arith.constant 0 : i32
    %c0_i32_0 = arith.constant 0 : i32
    %c0_i32_1 = arith.constant 0 : i32
    %c0_i32_2 = arith.constant 0 : i32
    return %arg0, %c0_i32, %c0_i32_0, %c0_i32_1 : i32, i32, i32, i32
  }
  func.func @transform_3(%arg0: i32, %arg1: memref<3xi32, #tpu.memory_space<smem>>) -> (i32, i32, i32) {
    %c0_i32 = arith.constant 0 : i32
    %c0_i32_0 = arith.constant 0 : i32
    %c0_i32_1 = arith.constant 0 : i32
    return %arg0, %c0_i32, %c0_i32_0 : i32, i32, i32
  }
  func.func @transform_4(%arg0: i32, %arg1: memref<3xi32, #tpu.memory_space<smem>>) -> (i32, i32) {
    %c0_i32 = arith.constant 0 : i32
    %c0_i32_0 = arith.constant 0 : i32
    %c0_i32_1 = arith.constant 0 : i32
    return %c0_i32, %c0_i32_0 : i32, i32
  }
  func.func @transform_5(%arg0: i32, %arg1: memref<3xi32, #tpu.memory_space<smem>>) -> (i32, i32) {
    %c0_i32 = arith.constant 0 : i32
    %c0_i32_0 = arith.constant 0 : i32
    %c0_i32_1 = arith.constant 0 : i32
    return %c0_i32, %c0_i32_0 : i32, i32
  }
  func.func @transform_6(%arg0: i32, %arg1: memref<3xi32, #tpu.memory_space<smem>>) -> (i32, i32) {
    %c0_i32 = arith.constant 0 : i32
    %c0_i32_0 = arith.constant 0 : i32
    %c0_i32_1 = arith.constant 0 : i32
    return %c0_i32, %c0_i32_0 : i32, i32
  }
  func.func @transform_7(%arg0: i32, %arg1: memref<3xi32, #tpu.memory_space<smem>>) -> (i32, i32) {
    %c0_i32 = arith.constant 0 : i32
    %c0_i32_0 = arith.constant 0 : i32
    %c0_i32_1 = arith.constant 0 : i32
    return %c0_i32, %c0_i32_0 : i32, i32
  }
  func.func @transform_8(%arg0: i32, %arg1: memref<3xi32, #tpu.memory_space<smem>>) -> (i32, i32) {
    %c0_i32 = arith.constant 0 : i32
    %c0_i32_0 = arith.constant 0 : i32
    %c0_i32_1 = arith.constant 0 : i32
    return %c0_i32, %c0_i32_0 : i32, i32
  }
  func.func @transform_9(%arg0: i32, %arg1: memref<3xi32, #tpu.memory_space<smem>>) -> (i32, i32) {
    %c0_i32 = arith.constant 0 : i32
    %c0_i32_0 = arith.constant 0 : i32
    %c0_i32_1 = arith.constant 0 : i32
    return %c0_i32, %c0_i32_0 : i32, i32
  }
  func.func @transform_10(%arg0: i32, %arg1: memref<3xi32, #tpu.memory_space<smem>>) -> (i32, i32) {
    %c0_i32 = arith.constant 0 : i32
    %c0_i32_0 = arith.constant 0 : i32
    %c0_i32_1 = arith.constant 0 : i32
    return %c0_i32, %c0_i32_0 : i32, i32
  }
  func.func @transform_11(%arg0: i32, %arg1: memref<3xi32, #tpu.memory_space<smem>>) -> (i32, i32) {
    %c0_i32 = arith.constant 0 : i32
    %c0_i32_0 = arith.constant 0 : i32
    %c0_i32_1 = arith.constant 0 : i32
    return %c0_i32, %c0_i32_0 : i32, i32
  }
  func.func @transform_12(%arg0: i32, %arg1: memref<3xi32, #tpu.memory_space<smem>>) -> (i32, i32) {
    %c0_i32 = arith.constant 0 : i32
    %c0_i32_0 = arith.constant 0 : i32
    %c0_i32_1 = arith.constant 0 : i32
    return %c0_i32, %c0_i32_0 : i32, i32
  }
  func.func @transform_13(%arg0: i32, %arg1: memref<3xi32, #tpu.memory_space<smem>>) -> (i32, i32) {
    %c0_i32 = arith.constant 0 : i32
    %c0_i32_0 = arith.constant 0 : i32
    %c0_i32_1 = arith.constant 0 : i32
    return %c0_i32, %c0_i32_0 : i32, i32
  }
  func.func @transform_14(%arg0: i32, %arg1: memref<3xi32, #tpu.memory_space<smem>>) -> (i32, i32) {
    %c0_i32 = arith.constant 0 : i32
    %c0_i32_0 = arith.constant 0 : i32
    %c0_i32_1 = arith.constant 0 : i32
    return %c0_i32, %c0_i32_0 : i32, i32
  }
  func.func @transform_15(%arg0: i32, %arg1: memref<3xi32, #tpu.memory_space<smem>>) -> (i32, i32) {
    %c0_i32 = arith.constant 0 : i32
    %c0_i32_0 = arith.constant 0 : i32
    %c0_i32_1 = arith.constant 0 : i32
    return %c0_i32, %c0_i32_0 : i32, i32
  }
  func.func @transform_16(%arg0: i32, %arg1: memref<3xi32, #tpu.memory_space<smem>>) -> (i32, i32, i32) {
    %c0_i32 = arith.constant 0 : i32
    %c0_i32_0 = arith.constant 0 : i32
    %c0_i32_1 = arith.constant 0 : i32
    return %arg0, %c0_i32, %c0_i32_0 : i32, i32, i32
  }
}

</mosaic_0001>

<bundles_post_ra>
// kernel: _step_batch_impl.1
= control target key start
LH: loop header
LB: loop body
LE: loop exit
PB: predicated region body
PF: predicated region fallthrough
CT: control target
= control target key end

     0   :  { %s4270_s0 = inlined_call_operand.vmem [shape: s32[3], index: 0, kind: input, shape index: {}]   ;;  %s4271_s1 = inlined_call_operand.vmem [shape: bf16[3,8,128], index: 1, kind: input, shape index: {}]   ;;  %s4272_s2 = inlined_call_operand.vmem [shape: f32[3,1,8], index: 2, kind: input, shape index: {}]   ;;  %s4273_s3 = inlined_call_operand.vmem [shape: bf16[3,2,8,128], index: 3, kind: input, shape index: {}]   ;;  %s4274_s4 = inlined_call_operand.vmem [shape: f32[3,2,8], index: 4, kind: input, shape index: {}]   ;;  %s4275_s5 = inlined_call_operand.vmem [shape: bf16[128,128], index: 5, kind: input, shape index: {}]   ;;  %s4276_s6 = inlined_call_operand.vmem [shape: f32[1,128], index: 6, kind: input, shape index: {}]   ;;  %s4277_s7 = inlined_call_operand.vmem [shape: bf16[128,128], index: 7, kind: input, shape index: {}]   ;;  %s4278_s8 = inlined_call_operand.vmem [shape: f32[1,128], index: 8, kind: input, shape index: {}]   ;;  %s4279_s9 = inlined_call_operand.hbm [shape: bf16[128,384], index: 9, kind: input, shape index: {}]   ;;  %s4280_s10 = inlined_call_operand.vmem [shape: f32[128,384], index: 10, kind: input, shape index: {}]   ;;  %s4281_s11 = inlined_call_operand.vmem [shape: f32[1,384], index: 11, kind: input, shape index: {}]   ;;  %s4282_s12 = inlined_call_operand.vmem [shape: f32[1,384], index: 12, kind: input, shape index: {}]   ;;  %s4283_s13 = inlined_call_operand.hbm [shape: bf16[128,384], index: 13, kind: input, shape index: {}]   ;;  %s4284_s14 = inlined_call_operand.hbm [shape: f32[128,384], index: 14, kind: input, shape index: {}]   ;;  %s4285_s15 = inlined_call_operand.vmem [shape: f32[1,384], index: 15, kind: input, shape index: {}]   ;;  %s4286_s16 = inlined_call_operand.vmem [shape: f32[1,384], index: 16, kind: input, shape index: {}]   ;;  %s4287_s17 = inlined_call_operand.vmem [shape: f32[3,1,128], index: 17, kind: output, shape index: {}]  }
   0x1   :  { %4289 = sst [smem:[#allocation15_spill]] %s4270_s0 }
   0x2   :  { %4290 = sst [smem:[#allocation16_spill]] %s4271_s1  ;;  %s4294_s26 = sld [smem:[#allocation15_spill]] }
   0x3   :  { %4291 = sst [smem:[#allocation17_spill]] %s4276_s6 }
   0x4   :  { %4292 = sst [smem:[#allocation18_spill]] %s4286_s16 }
   0x5   :  { %4293 = sst [smem:[#allocation19_spill]] %s4287_s17 }
   0x8   :  { %s22_s6 = sshll.u32 %s4294_s26, 4  ;;  %s23_s6 = int_to_ptr.vmem [resolvable:$true] %s22_s6 }
   0x9   :  { %s3387_s27 = scalar_lea.vmem %s23_s6, 16  ;;  %p3392_p1 = scmp.lt.s32.totalorder %s23_s6, %s23_s6 }
   0xa   :  { %p3388_p0 = scmp.ne.s32.totalorder %s23_s6, %s3387_s27  ;;  %p3393_p2 = scmp.lt.s32.totalorder %s3387_s27, %s3387_s27 }
   0xc   :  { %p3394_p3 = por %p3393_p2, %p3392_p1 }
   0xe   :  { %p3395_p4 = pnand %p3394_p3, %p3388_p0 }
  0x10   :  { %3398 = shalt.err (!%p3395_p4)  }
  0x11   :  { %s3501_s28 = smov [#allocation5]  }
  0x12   :  { %25 = dma.vmem_to_smem %s23_s6, 16, %s3501_s28, [#allocation4] }
  0x13   :  { %3487 = dma.done.wait [#allocation4], 16 }
  0x14   :  { %3488 = vsyncadd [#allocation4], 4294967280 }
  0x15   :  { %27 = sfence }
  0x16   :  { %28 = vsyncpa [#allocation7], 0 }
  0x17   :  { %29 = vsyncpa [#allocation9], 0  ;;  %s3608_s29 = smov 0  }
  0x18 LB: > { %4295 = sst [smem:[#allocation14_spill]] %s3499_s29  ;;  %s3614_s0 = sadd.s32 4294967295, %s3499_s29   ;;  %s3499_s29 = sphi %s3608_s29, %s35_s29  }
  0x19   : > { %p2538_p5 = scmp.ge.s32.totalorder %s3499_s29, 1  ;;  %p422_p6 = scmp.lt.s32.totalorder %s3499_s29, 4 }
  0x1a   : > { %p3229_p7 = scmp.eq.s32.totalorder %s3614_s0, 0  ;;  %s3502_s30 = smov [#allocation8]  }
  0x1b   : > { %p3619_p8 = pnand %p2538_p5, %p422_p6  ;;  %s468_s18 = sshll.u32 %s3502_s30, 4  ;;  %s3623_s18 = int_to_ptr.vmem [resolvable:$true] %s468_s18 }
  0x1c   : > { %s3503_s19 = smov [#allocation6]   ;;  %s3504_s21 = smov [#allocation10]  }
  0x1d   : > { %p3219_p9 = pneg %p3619_p8  ;;  %s446_s1 = sshll.u32 %s3503_s19, 4  ;;  %s3627_s1 = int_to_ptr.vmem [resolvable:$true] %s446_s1 }
  0x1e   : > { %s481_s22 = sshll.u32 %s3504_s21, 4  ;;  %s3399_s25 = scalar_lea.hbm %s4283_s13, 3072  ;;  %s3635_s22 = int_to_ptr.vmem [resolvable:$true] %s481_s22 }
  0x1f   : > { %p3631_p10 = pnand %p3229_p7, %p3219_p9  ;;  %p3400_p11 = scmp.ne.s32.totalorder %s4283_s13, %s3399_s25 }
  0x20   : > { %p3406_p1 = scmp.lt.u32.totalorder %s3399_s25, %s4283_s13 }
  0x21   : > { %p3645_p12 = pneg %p3631_p10 }
  0x23   : > { %p3402_p13 = pnand %p3645_p12, %p3400_p11 }
  0x25   : > { %p3403_p0 = pneg %p3402_p13 }
  0x27   : > { %p3408_p2 = pnand %p3406_p1, %p3403_p0 }
  0x29   : > { %3411 = shalt.err (!%p3408_p2)
}
  0x2a   : > { %s3412_s21 = scalar_lea.vmem %s3623_s18, 3072  ;;  %p3420_p6 = scmp.lt.s32.totalorder %s3623_s18, %s3623_s18 }
  0x2b   : > { %p3413_p3 = scmp.ne.s32.totalorder %s3623_s18, %s3412_s21  ;;  %p3421_p9 = scmp.lt.s32.totalorder %s3412_s21, %s3412_s21 }
  0x2d   : > { %p3415_p4 = pnand %p3413_p3, %p3645_p12  ;;  %p3422_p11 = por %p3421_p9, %p3420_p6 }
  0x2f   : > { %p3416_p5 = pneg %p3415_p4 }
  0x31   : > { %p3423_p13 = pnand %p3422_p11, %p3416_p5 }
  0x33   : > { %3426 = shalt.err (!%p3423_p13)
}
  0x34   : > { %s3505_s23 = smov 192   ;;  %s3506_s24 = smov 12  }
  0x35   : > { %3225 = dma.hbm_to_vmem [thread:$0]  (!%p3631_p10), %s4283_s13, 3072, %s3623_s18, [#allocation9], %s3505_s23, %s3505_s23, %s3506_s24  }
  0x36   : > { %s3427_s19 = scalar_lea.hbm %s4279_s9, 3072 }
  0x37   : > { %p3428_p0 = scmp.ne.s32.totalorder %s4279_s9, %s3427_s19  ;;  %p3434_p3 = scmp.lt.u32.totalorder %s3427_s19, %s4279_s9 }
  0x39   : > { %p3430_p1 = pnand %p3428_p0, %p3645_p12 }
  0x3b   : > { %p3431_p2 = pneg %p3430_p1 }
  0x3d   : > { %p3436_p4 = pnand %p3434_p3, %p3431_p2 }
  0x3f   : > { %3439 = shalt.err (!%p3436_p4)
}
  0x40   : > { %s3440_s18 = scalar_lea.vmem %s3627_s1, 3072  ;;  %p3448_p11 = scmp.lt.s32.totalorder %s3627_s1, %s3627_s1 }
  0x41   : > { %p3441_p5 = scmp.ne.s32.totalorder %s3627_s1, %s3440_s18  ;;  %p3449_p13 = scmp.lt.s32.totalorder %s3440_s18, %s3440_s18 }
  0x43   : > { %p3443_p6 = pnand %p3441_p5, %p3645_p12  ;;  %p3450_p0 = por %p3449_p13, %p3448_p11 }
  0x45   : > { %p3444_p9 = pneg %p3443_p6 }
  0x47   : > { %p3451_p1 = pnand %p3450_p0, %p3444_p9 }
  0x49   : > { %3454 = shalt.err (!%p3451_p1)
}
  0x4a   : > { %3222 = dma.hbm_to_vmem [thread:$0]  (!%p3631_p10), %s4279_s9, 3072, %s3627_s1, [#allocation7], %s3505_s23, %s3505_s23, %s3506_s24  }
  0x4b   : > { %s3455_s26 = scalar_lea.hbm %s4284_s14, 6144 }
  0x4c   : > { %p3456_p2 = scmp.ne.s32.totalorder %s4284_s14, %s3455_s26  ;;  %p3462_p5 = scmp.lt.u32.totalorder %s3455_s26, %s4284_s14 }
  0x4e   : > { %p3458_p3 = pnand %p3456_p2, %p3645_p12 }
  0x50   : > { %p3459_p4 = pneg %p3458_p3 }
  0x52   : > { %p3464_p6 = pnand %p3462_p5, %p3459_p4 }
  0x54   : > { %3467 = shalt.err (!%p3464_p6)
}
  0x55   : > { %s3468_s1 = scalar_lea.vmem %s3635_s22, 6144  ;;  %p3476_p0 = scmp.lt.s32.totalorder %s3635_s22, %s3635_s22 }
  0x56   : > { %p3469_p9 = scmp.ne.s32.totalorder %s3635_s22, %s3468_s1  ;;  %p3477_p1 = scmp.lt.s32.totalorder %s3468_s1, %s3468_s1 }
  0x58   : > { %p3471_p11 = pnand %p3469_p9, %p3645_p12  ;;  %p3478_p2 = por %p3477_p1, %p3476_p0 }
  0x5a   : > { %p3472_p13 = pneg %p3471_p11 }
  0x5c   : > { %p3479_p3 = pnand %p3478_p2, %p3472_p13 }
  0x5e   : > { %3482 = shalt.err (!%p3479_p3)
}
  0x5f   : > { %s3507_s23 = smov 384   ;;  %s3508_s24 = smov 24  }
  0x60   : > { %3228 = dma.hbm_to_vmem [thread:$0]  (!%p3631_p10), %s4284_s14, 6144, %s3635_s22, [#allocation9], %s3507_s23, %s3507_s23, %s3508_s24  }
  0x61   : > { %531 = sbr.rel (%p3619_p8) target bundleno = 1706 (0x6aa), region = 84 }
  0x68   : > { %3490 = dma.done.wait (%p3229_p7), [#allocation7], 3072  }
  0x69   : > { %3492 = vsyncadd (%p3229_p7), [#allocation7], 4294964224 }
  0x6a   : > { %3494 = dma.done.wait (%p3229_p7), [#allocation9], 9216  }
  0x6b   : > { %3496 = vsyncadd (%p3229_p7), [#allocation9], 4294958080  ;;  %p598_p12 = scmp.lt.s32.totalorder %s3614_s0, 2  ;;  %v814_v0 = vlaneseq  ;;  %v3509_v1 = vmov 0.0   ;;  %vm3510_vm0 = vmmov 0   ;;  %vm648_vm1 = vcmask 1043456  }
  0x6c   : > { %2771 = vmatprep.subr.bf16.mxu0 %v3509_v1  ;;  %2773 = vmatprep.mubr.msk.bf16.mxu0 %vm3510_vm0, %v3509_v1  ;;  %v3511_v2 = vmov 1966171168   ;;  %vm804_vm2 = vcmask 58368   ;;  %vm644_vm3 = vcmask 64512   ;;  %v3257_v22 = vld [vmem:[%s4277_s7] sm:$0xff]   ;;  %v3258_v23 = vld [vmem:[%s4277_s7 + $0x8] sm:$0xff]  }
  0x6d   : > { %s3727_s6 = scalar_select %p598_p12, %s3614_s0, 2  ;;  %v812_v3 = vunpack.c.l.s4 %v3511_v2  ;;  %v3729_v4 = vshrl.u32 %v814_v0, 7  ;;  %2745 = vmatprep.subr.bf16.mxu1 %v3509_v1  ;;  %2747 = vmatprep.mubr.msk.bf16.mxu1 %vm3510_vm0, %v3509_v1  ;;  %v3259_v28 = vld [vmem:[%s4277_s7 + $0x10] sm:$0xff]   ;;  %v3260_v29 = vld [vmem:[%s4277_s7 + $0x18] sm:$0xff]   ;;  %v3261_v30 = vld [vmem:[%s4277_s7 + $0x20] sm:$0xff]   ;;  %vm638_vm4 = vcmask 57344  }
  0x6e   : > { %s4299_s28 = sld [smem:[#allocation16_spill]]  ;;  %v3262_v31 = vld [vmem:[%s4277_s7 + $0x28] sm:$0xff]   ;;  %v3263_v32 = vld [vmem:[%s4277_s7 + $0x30] sm:$0xff]   ;;  %v3264_v33 = vld [vmem:[%s4277_s7 + $0x38] sm:$0xff]   ;;  %vm950_vm5 = vcmask 1041409   ;;  %s4304_s23 = sld [smem:[#allocation18_spill]] }
  0x6f   : > { %s2634_s20 = sshll.u32 %s3727_s6, 3  ;;  %v813_v5 = vunpack.c.0.s8 %v812_v3  ;;  %s2550_s29 = sshll.u32 %s3727_s6, 1  ;;  %v3744_v7 = vsub.s32 0, %v3729_v4  ;;  %v3265_v34 = vld [vmem:[%s4275_s5] sm:$0xff]   ;;  %v3266_v36 = vld [vmem:[%s4275_s5 + $0x8] sm:$0xff]   ;;  %v3267_v37 = vld [vmem:[%s4275_s5 + $0x10] sm:$0xff]  }
  0x70   : > { %s609_s17 = scalar_lea.vmem %s4273_s3, %s2634_s20  ;;  %s613_s27 = scalar_lea.vmem %s4274_s4, %s2550_s29  ;;  %v3268_v38 = vld [vmem:[%s4275_s5 + $0x18] sm:$0xff]   ;;  %v3269_v39 = vld [vmem:[%s4275_s5 + $0x20] sm:$0xff]   ;;  %v3270_v40 = vld [vmem:[%s4275_s5 + $0x28] sm:$0xff]  }
  0x71   : > { %v816_v6 = vsub.s32 %v813_v5, %v3729_v4  ;;  %v784_v8 = vld [vmem:[%s609_s17] sm:$0xf]  ;;  %v785_v9 = vld [vmem:[%s609_s17 + $0x4] sm:$0xf]  ;;  %s2547_s21 = sshll.u32 %s3727_s6, 2  ;;  %s604_s16 = scalar_lea.vmem %s4272_s2, %s3727_s6  ;;  %v3271_v41 = vld [vmem:[%s4275_s5 + $0x30] sm:$0xff]  }
  0x72   : > { %v786_v10 = vld [vmem:[%s613_s27] sm:$0x3]  ;;  %v836_v11 = vsel %vm648_vm1, %v784_v8, 0  ;;  %v887_v13 = vsel %vm648_vm1, %v785_v9, 0  ;;  %v3272_v42 = vld [vmem:[%s4275_s5 + $0x38] sm:$0xff]   ;;  %s4115_s26 = sld [smem:[#allocation5 + %s3614_s0]] }
  0x73   : > { %v809_v12 = vpack.c.bf16 %v786_v10, %v786_v10  ;;  %v805_v14 = vsel %vm804_vm2, %v786_v10, 0.0  ;;  %2772 = vmatpush3.bf16.msra.mxu0 %v836_v11  ;;  %v620_v24 = vld [vmem:[%s604_s16] sm:$0x1]  ;;  %v3275_v43 = vld [vmem:[#allocation6 + $0x4] ss:$12 sps:$4 sm:$0xff]   ;;  %s4305_s16 = sld [smem:[#allocation17_spill]] }
  0x74   : > { %806 = vadd.xlane.f32.xlu0 %v805_v14  ;;  %2777 = vmatprep.subr.bf16.mxu0 %v3509_v1  ;;  %s601_s17 = scalar_lea.vmem %s4299_s28, %s2547_s21  ;;  %v643_v27 = vpack.c.bf16 %v620_v24, %v620_v24  ;;  %v639_v35 = vsel %vm638_vm4, %v620_v24, 0.0  ;;  %v3276_v5 = vld [vmem:[#allocation6 + $0x8] ss:$12 sps:$4 sm:$0xff]   ;;  %v3280_v10 = vld [vmem:[#allocation6 + $0x20] ss:$12 sps:$4 sm:$0xff]   ;;  %s4306_s28 = sld [smem:[#allocation19_spill]] }
  0x75   : > { %v817_v15 = vrot.slane %v809_v12, %v816_v6  ;;  %v619_v25 = vld [vmem:[%s601_s17] sm:$0xf]  ;;  %v3288_v12 = vld [vmem:[#allocation6 + $0x50] ss:$12 sps:$4 sm:$0xff]   ;;  %v3285_v24 = vld [vmem:[#allocation6 + $0x48] ss:$12 sps:$4 sm:$0xff]  }
  0x76   : > { %v650_v26 = vsel %vm648_vm1, %v619_v25, 0  ;;  %v3284_v11 = vld [vmem:[#allocation6 + $0x38] ss:$12 sps:$4 sm:$0xff]  }
  0x77   : > { %v824_v16 = vrot.slane %v817_v15, %v816_v6  ;;  %2746 = vmatpush3.bf16.msra.mxu1 %v650_v26  ;;  %v3291_v25 = vld [vmem:[#allocation6 + $0x64] ss:$12 sps:$4 sm:$0xff]   ;;  %v3289_v26 = vld [vmem:[#allocation6 + $0x60] ss:$12 sps:$4 sm:$0xff]  }
  0x78   : > { %2751 = vmatprep.subr.bf16.mxu1 %v3509_v1  ;;  %640 = vadd.xlane.f32.xlu0 %v639_v35  ;;  %v3301_v35 = vld [vmem:[#allocation6 + $0xa8] ss:$12 sps:$4 sm:$0xff]   ;;  %p1556_p7 = scmp.gt.s32.totalorder %s4115_s26, 0  ;;  %p1731_p8 = scmp.gt.s32.totalorder %s4115_s26, 1 }
  0x79   : > { %v826_v17 = vunpack.i.h.s16 %v824_v16  ;;  %v2560_v18 = vpack.i.b16 %v824_v16, %v824_v16 }
  0x7a   : > { %2748 = vmatmul.mubr.msk.bf16.vlgmr.msra.gmra.mrb[0].mxu1 %vm644_vm3, %v643_v27  ;;  %v3292_v27 = vld [vmem:[#allocation6 + $0x68] ss:$12 sps:$4 sm:$0xff]   ;;  %s1557_s27 = scalar_select %p1556_p7, 1, 0 }
  0x7b   : > { %v831_v19 = vrot.slane %v2560_v18, %v3744_v7  ;;  %v878_v20 = vpack.i.b16 %v826_v17, %v826_v17  ;;  %2767 = vmatprep.mubr.msk.bf16.mxu1 %vm3510_vm0, %v3509_v1  ;;  %2752 = vmatpush3.bf16.msra.mxu1 %v3265_v34  ;;  %v3273_v17 = vld [vmem:[#allocation6] ss:$12 sps:$4 sm:$0xff]   ;;  %s1732_s0 = scalar_select %p1731_p8, 1, 0 }
  0x7c   : > { %2753 = vmatprep.subr.bf16.mxu1 %v3509_v1  ;;  %v3303_v34 = vld [vmem:[#allocation6 + $0xac] ss:$12 sps:$4 sm:$0xff]   ;;  %s616_s17 = scalar_lea.vmem %s4306_s28, %s3727_s6 }
  0x7d   : > { %2774 = vmatmul.mubr.msk.bf16.vlgmr.msra.gmra.mrb[0].mxu0 %vm644_vm3, %v831_v19  ;;  %v882_v21 = vrot.slane %v878_v20, %v3744_v7  ;;  %v3279_v19 = vld [vmem:[#allocation6 + $0x1c] ss:$12 sps:$4 sm:$0xff]   ;;  %v3277_v20 = vld [vmem:[#allocation6 + $0x18] ss:$12 sps:$4 sm:$0xff]  }
  0x7e   : > { %2778 = vmatpush3.bf16.msra.mxu0 %v887_v13  ;;  %2779 = vmatprep.mubr.msk.bf16.mxu0 %vm3510_vm0, %v3509_v1 }
  0x7f   : > { %2783 = vmatprep.subr.bf16.mxu0 %v3509_v1  ;;  %2754 = vmatpush3.bf16.msra.mxu1 %v3266_v36  ;;  %v3304_v36 = vld [vmem:[#allocation6 + $0xb0] ss:$12 sps:$4 sm:$0xff]  }
  0x80   : > { %2755 = vmatprep.subr.bf16.mxu1 %v3509_v1 }
  0x83   : > { %2756 = vmatpush3.bf16.msra.mxu1 %v3267_v37  ;;  %v1324_v37 = vld [vmem:[%s4280_s10 + $0x8] sm:$0xff] }
  0x84   : > { %2757 = vmatprep.subr.bf16.mxu1 %v3509_v1 }
  0x85   : > { %2780 = vmatmul.mubr.msk.bf16.vlgmr.msra.gmra.mrb[4].mxu0 %vm644_vm3, %v882_v21  ;;  %v3283_v21 = vld [vmem:[#allocation6 + $0x34] ss:$12 sps:$4 sm:$0xff]  }
  0x86   : > { %2799 = vmatprep.mubr.msk.bf16.mxu0 %vm3510_vm0, %v3509_v1  ;;  %2784 = vmatpush3.bf16.msra.mxu0 %v3257_v22  ;;  %v3281_v22 = vld [vmem:[#allocation6 + $0x30] ss:$12 sps:$4 sm:$0xff]  }
  0x87   : > { %2785 = vmatprep.subr.bf16.mxu0 %v3509_v1  ;;  %2758 = vmatpush3.bf16.msra.mxu1 %v3268_v38  ;;  %v1327_v38 = vld [vmem:[%s4280_s10 + $0x20] sm:$0xff] }
  0x88   : > { %2759 = vmatprep.subr.bf16.mxu1 %v3509_v1 }
  0x8a   : > { %2786 = vmatpush3.bf16.msra.mxu0 %v3258_v23  ;;  %v3287_v23 = vld [vmem:[#allocation6 + $0x4c] ss:$12 sps:$4 sm:$0xff]  }
  0x8b   : > { %2787 = vmatprep.subr.bf16.mxu0 %v3509_v1  ;;  %2760 = vmatpush3.bf16.msra.mxu1 %v3269_v39  ;;  %v3849_v39 = vpack.c.bf16 %v1327_v38, %v1324_v37  ;;  %v1358_v37 = vld [vmem:[%s4280_s10 + $0x118] sm:$0xff]  ;;  %v1360_v38 = vld [vmem:[%s4280_s10 + $0x128] sm:$0xff] }
  0x8c   : > { %2761 = vmatprep.subr.bf16.mxu1 %v3509_v1 }
  0x8e   : > { %2788 = vmatpush3.bf16.msra.mxu0 %v3259_v28  ;;  %v3295_v28 = vld [vmem:[#allocation6 + $0x7c] ss:$12 sps:$4 sm:$0xff]  }
  0x8f   : > { %2789 = vmatprep.subr.bf16.mxu0 %v3509_v1  ;;  %2762 = vmatpush3.bf16.msra.mxu1 %v3270_v40  ;;  %v3512_v40 = vmov 0  }
  0x90   : > { %2763 = vmatprep.subr.bf16.mxu1 %v3509_v1 }
  0x92   : > { %2790 = vmatpush3.bf16.msra.mxu0 %v3260_v29  ;;  %v3293_v29 = vld [vmem:[#allocation6 + $0x78] ss:$12 sps:$4 sm:$0xff]  }
  0x93   : > { %2791 = vmatprep.subr.bf16.mxu0 %v3509_v1  ;;  %2764 = vmatpush3.bf16.msra.mxu1 %v3271_v41  ;;  %v3513_v41 = vmov 0.0|0.0  }
  0x94   : > { %2765 = vmatprep.subr.bf16.mxu1 %v3509_v1 }
  0x96   : > { %2792 = vmatpush3.bf16.msra.mxu0 %v3261_v30  ;;  %v3296_v30 = vld [vmem:[#allocation6 + $0x80] ss:$12 sps:$4 sm:$0xff]  }
  0x97   : > { %2793 = vmatprep.subr.bf16.mxu0 %v3509_v1  ;;  %2766 = vmatpush3.bf16.msra.mxu1 %v3272_v42  ;;  %v2563_v42 = vld [vmem:[%s4278_s8] ss:$0 sm:$0xff] }
  0x98   : > { %1221 = vmatprep.subr.bf16.mxu1 %v3275_v43 }
  0x9a   : > { %2794 = vmatpush3.bf16.msra.mxu0 %v3262_v31  ;;  %v3299_v31 = vld [vmem:[#allocation6 + $0x94] ss:$12 sps:$4 sm:$0xff]  }
  0x9b   : > { %2795 = vmatprep.subr.bf16.mxu0 %v3509_v1 }
  0x9e   : > { %2796 = vmatpush3.bf16.msra.mxu0 %v3263_v32  ;;  %v3297_v32 = vld [vmem:[#allocation6 + $0x90] ss:$12 sps:$4 sm:$0xff]  }
  0x9f   : > { %2797 = vmatprep.subr.bf16.mxu0 %v3509_v1 }
  0xa2   : > { %2798 = vmatpush3.bf16.msra.mxu0 %v3264_v33  ;;  %v3300_v33 = vld [vmem:[#allocation6 + $0x98] ss:$12 sps:$4 sm:$0xff]  }
  0xa3   : > { %2803 = vmatprep.subr.bf16.mxu0 %v3509_v1 }
 0x101   : > { %v807_v44 = vpop.xlane.xlu0 %806 }
 0x102   : > { %v808_v45 = vmax.f32 %v807_v44, 1.0 }
 0x104   : > { %v930_v46 = vrot.slane %v808_v45, 1  ;;  %3337 = vrcp.f32 %v808_v45 }
 0x105   : > { %v641_v13 = vpop.xlane.xlu0 %640 }
 0x106   : > { %3339 = vrcp.f32 %v930_v46  ;;  %v642_v14 = vmax.f32 %v641_v13, 1.0 }
 0x108   : > { %3341 = vrcp.f32 %v642_v14  ;;  %v1341_v14 = vld [vmem:[%s4280_s10 + $0x90] sm:$0xff] }
 0x10e   : > { %v3338_v51 = vpop.eup %3337 }
 0x110   : > { %v3340_v52 = vpop.eup %3339 }
 0x112   : > { %v3342_v15 = vpop.eup %3341 }
 0x14d   : > { %v686_v0 = vpop.f32.mrb[0].mxu1 }
 0x14e   : > { %v2749_v3 = vpop.f32.mrb[1].mxu1  ;;  %v693_v16 = vmul.f32 %v3342_v15, %v686_v0  ;;  %v1339_v0 = vld [vmem:[%s4280_s10 + $0x80] sm:$0xff] }
 0x14f   : > { %v689_v8 = vpop.f32.mrb[2].mxu1  ;;  %v1335_v3 = vld [vmem:[%s4280_s10 + $0x60] sm:$0xff] }
 0x150   : > { %v872_v47 = vpop.f32.mrb[0].mxu0  ;;  %v2750_v9 = vpop.f32.mrb[3].mxu1  ;;  %v694_v18 = vpack.c.bf16 %v693_v16, %v693_v16  ;;  %v1338_v8 = vld [vmem:[%s4280_s10 + $0x78] sm:$0xff] }
 0x151   : > { %v2775_v48 = vpop.f32.mrb[1].mxu0  ;;  %v934_v53 = vmul.f32 %v3338_v51, %v872_v47  ;;  %v1328_v51 = vld [vmem:[%s4280_s10 + $0x28] sm:$0xff]  ;;  %v1337_v9 = vld [vmem:[%s4280_s10 + $0x70] sm:$0xff]  ;;  %v3931_v13 = vpack.c.bf16 %v1338_v8, %v1335_v3  ;;  %v1370_v3 = vld [vmem:[%s4280_s10 + $0x178] sm:$0xff] }
 0x152   : > { %v875_v49 = vpop.f32.mrb[2].mxu0  ;;  %2768 = vmatmul.mubr.bf16.vlgmr.msra.gmra.mrb[4].mxu1 %v694_v18  ;;  %v1323_v48 = vld [vmem:[%s4280_s10] sm:$0xff] }
 0x153   : > { %v2776_v50 = vpop.f32.mrb[3].mxu0  ;;  %v937_v58 = vpack.c.bf16 %v934_v53, %v934_v53  ;;  %1222 = vmatpush1.bf16.msra.mxu1 %v3273_v17  ;;  %1253 = vmatprep.mubr.bf16.mxu1 %v3512_v40  ;;  %v1326_v49 = vld [vmem:[%s4280_s10 + $0x18] sm:$0xff]  ;;  %v1333_v53 = vld [vmem:[%s4280_s10 + $0x50] sm:$0xff]  ;;  %v1344_v17 = vld [vmem:[%s4280_s10 + $0xa8] sm:$0xff] }
 0x154   : > { %1223 = vmatprep.subr.bf16.mxu1 %v3279_v19  ;;  %v1325_v50 = vld [vmem:[%s4280_s10 + $0x10] sm:$0xff]  ;;  %v1343_v18 = vld [vmem:[%s4280_s10 + $0xa0] sm:$0xff]  ;;  %v1346_v19 = vld [vmem:[%s4280_s10 + $0xb8] sm:$0xff] }
 0x155   : > { %v947_v62 = vunpack.c.l.b16 %v937_v58 }
 0x157   : > { %1224 = vmatpush1.bf16.msra.mxu1 %v3277_v20  ;;  %v1348_v20 = vld [vmem:[%s4280_s10 + $0xc8] sm:$0xff] }
 0x158   : > { %v923_v54 = vpop.f32.mrb[4].mxu0  ;;  %1225 = vmatprep.subr.bf16.mxu1 %v3283_v21  ;;  %v1351_v21 = vld [vmem:[%s4280_s10 + $0xe0] sm:$0xff] }
 0x159   : > { %v936_v55 = vmul.f32 %v3340_v52, %v923_v54  ;;  %v2781_v56 = vpop.f32.mrb[5].mxu0  ;;  %v1330_v52 = vld [vmem:[%s4280_s10 + $0x38] sm:$0xff] }
 0x15a   : > { %v926_v57 = vpop.f32.mrb[6].mxu0  ;;  %v1329_v56 = vld [vmem:[%s4280_s10 + $0x30] sm:$0xff] }
 0x15b   : > { %v938_v59 = vpack.c.bf16 %v936_v55, %v936_v55  ;;  %v2782_v60 = vpop.f32.mrb[7].mxu0  ;;  %1226 = vmatpush1.bf16.msra.mxu1 %v3281_v22  ;;  %v3875_v55 = vpack.c.bf16 %v1326_v49, %v1323_v48  ;;  %v3880_v57 = vpack.c.bf16 %v1328_v51, %v1325_v50  ;;  %v3959_v22 = vpack.c.bf16 %v1344_v17, %v1341_v14  ;;  %v1362_v48 = vld [vmem:[%s4280_s10 + $0x138] sm:$0xff]  ;;  %v1361_v49 = vld [vmem:[%s4280_s10 + $0x130] sm:$0xff]  ;;  %v1364_v50 = vld [vmem:[%s4280_s10 + $0x148] sm:$0xff] }
 0x15c   : > { %1227 = vmatprep.subr.bf16.mxu1 %v3287_v23  ;;  %v1332_v60 = vld [vmem:[%s4280_s10 + $0x48] sm:$0xff]  ;;  %v1347_v23 = vld [vmem:[%s4280_s10 + $0xc0] sm:$0xff] }
 0x15d   : > { %v948_v61 = vunpack.c.l.b16 %v938_v59  ;;  %v3882_v59 = vpack.c.bf16 %v1333_v53, %v1330_v52  ;;  %v1366_v52 = vld [vmem:[%s4280_s10 + $0x158] sm:$0xff]  ;;  %v1369_v53 = vld [vmem:[%s4280_s10 + $0x170] sm:$0xff] }
 0x15f   : > { %v949_v63 = vrot.slane %v948_v61, 7  ;;  %1228 = vmatpush1.bf16.msra.mxu1 %v3285_v24  ;;  %v1331_v61 = vld [vmem:[%s4280_s10 + $0x40] sm:$0xff]  ;;  %v3965_v24 = vpack.c.bf16 %v1346_v19, %v1343_v18 }
 0x160   : > { %1229 = vmatprep.subr.bf16.mxu1 %v3291_v25  ;;  %v3968_v25 = vpack.c.bf16 %v1351_v21, %v1348_v20 }
 0x161   : > { %v951_v2 = vsel %vm950_vm5, %v949_v63, %v947_v62  ;;  %v1334_v62 = vld [vmem:[%s4280_s10 + $0x58] sm:$0xff]  ;;  %v1336_v63 = vld [vmem:[%s4280_s10 + $0x68] sm:$0xff] }
 0x162   : > { %v952_v6 = vpack.c.b16 %v951_v2, %v951_v2  ;;  %v3900_v2 = vpack.c.bf16 %v1332_v60, %v1329_v56  ;;  %v1365_v60 = vld [vmem:[%s4280_s10 + $0x150] sm:$0xff] }
 0x163   : > { %1230 = vmatpush1.bf16.msra.mxu1 %v3289_v26  ;;  %v1350_v26 = vld [vmem:[%s4280_s10 + $0xd8] sm:$0xff] }
 0x164   : > { %2800 = vmatmul.mubr.bf16.vlgmr.msra.gmra.mrb[8].mxu0 %v952_v6  ;;  %1231 = vmatprep.subr.bf16.mxu1 %v3295_v28  ;;  %v3909_v6 = vpack.c.bf16 %v1339_v0, %v1336_v63  ;;  %v1352_v28 = vld [vmem:[%s4280_s10 + $0xe8] sm:$0xff]  ;;  %v1367_v0 = vld [vmem:[%s4280_s10 + $0x160] sm:$0xff] }
 0x165   : > { %2804 = vmatpush3.bf16.msra.mxu0 %v3276_v5  ;;  %2819 = vmatprep.mubr.msk.bf16.mxu0 %vm3510_vm0, %v3509_v1  ;;  %v3906_v5 = vpack.c.bf16 %v1334_v62, %v1331_v61  ;;  %v3034_v61 = vpack.c.bf16 %v1364_v50, %v1361_v49  ;;  %v3011_v62 = vpack.c.bf16 %v1369_v53, %v1366_v52  ;;  %v1368_v63 = vld [vmem:[%s4280_s10 + $0x168] sm:$0xff] }
 0x166   : > { %2805 = vmatprep.subr.bf16.mxu0 %v3509_v1  ;;  %v3013_v8 = vpack.c.bf16 %v1368_v63, %v1365_v60 }
 0x167   : > { %1232 = vmatpush1.bf16.msra.mxu1 %v3293_v29  ;;  %v1354_v29 = vld [vmem:[%s4280_s10 + $0xf8] sm:$0xff] }
 0x168   : > { %1233 = vmatprep.subr.bf16.mxu1 %v3299_v31  ;;  %v3987_v31 = vpack.c.bf16 %v1350_v26, %v1347_v23 }
 0x169   : > { %2806 = vmatpush3.bf16.msra.mxu0 %v3280_v10  ;;  %v1340_v10 = vld [vmem:[%s4280_s10 + $0x88] sm:$0xff] }
 0x16a   : > { %2807 = vmatprep.subr.bf16.mxu0 %v3509_v1  ;;  %v3937_v15 = vpack.c.bf16 %v1340_v10, %v1337_v9  ;;  %v3037_v9 = vpack.c.bf16 %v1370_v3, %v1367_v0 }
 0x16b   : > { %1234 = vmatpush1.bf16.msra.mxu1 %v3297_v32  ;;  %v1353_v32 = vld [vmem:[%s4280_s10 + $0xf0] sm:$0xff] }
 0x16c   : > { %1235 = vmatprep.subr.bf16.mxu1 %v3303_v34 }
 0x16d   : > { %2808 = vmatpush3.bf16.msra.mxu0 %v3284_v11  ;;  %v1342_v11 = vld [vmem:[%s4280_s10 + $0x98] sm:$0xff] }
 0x16e   : > { %2809 = vmatprep.subr.bf16.mxu0 %v3509_v1 }
 0x16f   : > { %1236 = vmatpush1.bf16.msra.mxu1 %v3301_v35  ;;  %v1356_v35 = vld [vmem:[%s4280_s10 + $0x108] sm:$0xff] }
 0x170   : > { %2984 = vmatprep.subr.bf16.mxu1 %v3849_v39 }
 0x171   : > { %2810 = vmatpush3.bf16.msra.mxu0 %v3288_v12  ;;  %v1345_v12 = vld [vmem:[%s4280_s10 + $0xb0] sm:$0xff] }
 0x172   : > { %2811 = vmatprep.subr.bf16.mxu0 %v3509_v1  ;;  %v3940_v16 = vpack.c.bf16 %v1345_v12, %v1342_v11 }
 0x175   : > { %2812 = vmatpush3.bf16.msra.mxu0 %v3292_v27  ;;  %v1349_v27 = vld [vmem:[%s4280_s10 + $0xd0] sm:$0xff] }
 0x176   : > { %2813 = vmatprep.subr.bf16.mxu0 %v3509_v1 }
 0x179   : > { %2814 = vmatpush3.bf16.msra.mxu0 %v3296_v30  ;;  %v1357_v30 = vld [vmem:[%s4280_s10 + $0x110] sm:$0xff] }
 0x17a   : > { %2815 = vmatprep.subr.bf16.mxu0 %v3509_v1  ;;  %v3996_v34 = vpack.c.bf16 %v1357_v30, %v1354_v29 }
 0x17d   : > { %2816 = vmatpush3.bf16.msra.mxu0 %v3300_v33  ;;  %v3993_v33 = vpack.c.bf16 %v1352_v28, %v1349_v27  ;;  %v1371_v28 = vld [vmem:[%s4282_s12] sm:$0x7] }
 0x17e   : > { %2817 = vmatprep.subr.bf16.mxu0 %v3509_v1  ;;  %v4103_v29 = vrot.slane %v1371_v28, %v3744_v7 }
 0x181   : > { %2818 = vmatpush3.bf16.msra.mxu0 %v3304_v36  ;;  %v1355_v36 = vld [vmem:[%s4280_s10 + $0x100] sm:$0xff] }
 0x182   : > { %3015 = vmatprep.subr.bf16.mxu0 %v3513_v41 }
 0x237   : > { %v1036_v43 = vpop.f32.mrb[8].mxu0 }
 0x238   : > { %v1037_v44 = vadd.f32 %v2563_v42, %v1036_v43  ;;  %v2801_v45 = vpop.f32.mrb[9].mxu0  ;;  %v1363_v42 = vld [vmem:[%s4280_s10 + $0x140] sm:$0xff]  ;;  %v3005_v43 = vpack.c.bf16 %v1356_v35, %v1353_v32 }
 0x239   : > { %v1039_v46 = vpop.f32.mrb[10].mxu0  ;;  %v3031_v45 = vpack.c.bf16 %v1358_v37, %v1355_v36 }
 0x23a   : > { %3343 = vtanh.f32 %v1037_v44  ;;  %v2802_v47 = vpop.f32.mrb[11].mxu0  ;;  %v1359_v44 = vld [vmem:[%s4280_s10 + $0x120] sm:$0xff]  ;;  %v4019_v46 = vpop.f32.mrb[4].mxu1 }
 0x23b   : > { %v3007_v47 = vpack.c.bf16 %v1363_v42, %v1360_v38  ;;  %v2769_v51 = vpop.f32.mrb[5].mxu1 }
 0x244   : > { %v3344_v54 = vpop.eup %3343 }
 0x245   : > { %v1043_v58 = vpack.c.bf16 %v3344_v54, %v3344_v54  ;;  %v780_v54 = vpop.f32.mrb[6].mxu1 }
 0x246   : > { %v2770_v56 = vpop.f32.mrb[7].mxu1 }
 0x247   : > { %1254 = vmatmul.mubr.bf16.vlgmr.msra.gmra.mrb[8].mxu1 %v1043_v58  ;;  %2820 = vmatmul.mubr.bf16.vlgmr.msra.gmra.mrb[12].mxu0 %v1043_v58  ;;  %v3009_v58 = vpack.c.bf16 %v1362_v48, %v1359_v44 }
 0x248   : > { %2986 = vmatpush1.bf16.msra.mxu1 %v3875_v55  ;;  %3017 = vmatpush3.bf16.msra.mxu0 %v3880_v57 }
 0x249   : > { %2988 = vmatprep.subr.bf16.mxu1 %v3882_v59  ;;  %1453 = vmatprep.mubr.f32.mxu1 %v3509_v1 }
 0x24a   : > { %3018 = vmatprep.subr.bf16.mxu0 %v3513_v41  ;;  %2855 = vmatprep.mubr.msk.f32.mxu0 %vm3510_vm0, %v3509_v1 }
 0x24c   : > { %2990 = vmatpush1.bf16.msra.mxu1 %v3900_v2  ;;  %3020 = vmatpush3.bf16.msra.mxu0 %v3906_v5 }
 0x24d   : > { %2992 = vmatprep.subr.bf16.mxu1 %v3909_v6  ;;  %3021 = vmatprep.subr.bf16.mxu0 %v3513_v41 }
 0x250   : > { %2994 = vmatpush1.bf16.msra.mxu1 %v3931_v13  ;;  %3023 = vmatpush3.bf16.msra.mxu0 %v3937_v15 }
 0x251   : > { %2996 = vmatprep.subr.bf16.mxu1 %v3940_v16  ;;  %3024 = vmatprep.subr.bf16.mxu0 %v3513_v41 }
 0x254   : > { %2998 = vmatpush1.bf16.msra.mxu1 %v3959_v22  ;;  %3026 = vmatpush3.bf16.msra.mxu0 %v3965_v24 }
 0x255   : > { %3000 = vmatprep.subr.bf16.mxu1 %v3968_v25  ;;  %3027 = vmatprep.subr.bf16.mxu0 %v3513_v41 }
 0x258   : > { %3002 = vmatpush1.bf16.msra.mxu1 %v3987_v31  ;;  %3029 = vmatpush3.bf16.msra.mxu0 %v3993_v33 }
 0x259   : > { %3004 = vmatprep.subr.bf16.mxu1 %v3996_v34  ;;  %3030 = vmatprep.subr.bf16.mxu0 %v3513_v41 }
 0x25c   : > { %3006 = vmatpush1.bf16.msra.mxu1 %v3005_v43  ;;  %3032 = vmatpush3.bf16.msra.mxu0 %v3031_v45 }
 0x25d   : > { %3008 = vmatprep.subr.bf16.mxu1 %v3007_v47  ;;  %3033 = vmatprep.subr.bf16.mxu0 %v3513_v41 }
 0x260   : > { %3010 = vmatpush1.bf16.msra.mxu1 %v3009_v58  ;;  %3035 = vmatpush3.bf16.msra.mxu0 %v3034_v61 }
 0x261   : > { %3012 = vmatprep.subr.bf16.mxu1 %v3011_v62  ;;  %3036 = vmatprep.subr.bf16.mxu0 %v3513_v41 }
 0x264   : > { %3014 = vmatpush1.bf16.msra.mxu1 %v3013_v8  ;;  %3038 = vmatpush3.bf16.msra.mxu0 %v3037_v9 }
 0x265   : > { %3040 = vmatprep.subr.bf16.mxu1 %v3849_v39  ;;  %3071 = vmatprep.subr.bf16.mxu0 %v3513_v41  ;;  %v1076_v39 = vld [vmem:[%s4281_s11] sm:$0x7] }
 0x267   : > { %1454 = vmatmul.mubr.f32.vlgmr.msra.gmra.mrb[12].mxu1 %v3509_v1  ;;  %2856 = vmatmul.mubr.f32.vlgmr.msra.gmra.mrb[16].mxu0 %v3509_v1 }
 0x268   : > { %3042 = vmatpush1.bf16.msra.mxu1 %v3875_v55  ;;  %3073 = vmatpush3.bf16.msra.mxu0 %v3880_v57  ;;  %v4086_v55 = vsub.s32 2, %v3729_v4  ;;  %v3514_v57 = vmov 1983009808  }
 0x269   : > { %3044 = vmatprep.subr.bf16.mxu1 %v3882_v59  ;;  %3074 = vmatprep.subr.bf16.mxu0 %v3513_v41  ;;  %v1307_v59 = vunpack.c.l.s4 %v3514_v57  ;;  %v3305_v57 = vld [vmem:[#allocation8] ss:$12 sps:$4 sm:$0xff]  }
 0x26a   : > { %1628 = vmatprep.mubr.f32.mxu1 %v3509_v1  ;;  %2890 = vmatprep.mubr.msk.f32.mxu0 %vm3510_vm0, %v3509_v1  ;;  %v4111_v48 = vrot.slane %v1371_v28, %v4086_v55 }
 0x26b   : > { %v1308_v10 = vunpack.c.0.s8 %v1307_v59  ;;  %v3308_v59 = vld [vmem:[#allocation8 + $0x8] ss:$12 sps:$4 sm:$0xff]  }
 0x26c   : > { %3046 = vmatpush1.bf16.msra.mxu1 %v3900_v2  ;;  %3076 = vmatpush3.bf16.msra.mxu0 %v3906_v5  ;;  %v4089_v2 = vsub.s32 1, %v3729_v4  ;;  %v1081_v5 = vrot.slane %v1076_v39, %v3744_v7 }
 0x26d   : > { %3048 = vmatprep.subr.bf16.mxu1 %v3909_v6  ;;  %3077 = vmatprep.subr.bf16.mxu0 %v3513_v41  ;;  %v1089_v6 = vrot.slane %v1076_v39, %v4086_v55  ;;  %v4095_v18 = vsub.s32 %v1308_v10, %v3729_v4  ;;  %v3312_v10 = vld [vmem:[#allocation8 + $0x20] ss:$12 sps:$4 sm:$0xff]  }
 0x26e   : > { %v1085_v11 = vrot.slane %v1076_v39, %v4089_v2  ;;  %v4106_v4 = vrot.slane %v1371_v28, %v4089_v2  ;;  %v3307_v39 = vld [vmem:[#allocation8 + $0x4] ss:$12 sps:$4 sm:$0xff]   ;;  %v3333_v28 = vld [vmem:[#allocation8 + $0xa8] ss:$12 sps:$4 sm:$0xff]  }
 0x270   : > { %3050 = vmatpush1.bf16.msra.mxu1 %v3931_v13  ;;  %3079 = vmatpush3.bf16.msra.mxu0 %v3937_v15 }
 0x271   : > { %3052 = vmatprep.subr.bf16.mxu1 %v3940_v16  ;;  %3080 = vmatprep.subr.bf16.mxu0 %v3513_v41 }
 0x274   : > { %3054 = vmatpush1.bf16.msra.mxu1 %v3959_v22  ;;  %3082 = vmatpush3.bf16.msra.mxu0 %v3965_v24 }
 0x275   : > { %3056 = vmatprep.subr.bf16.mxu1 %v3968_v25  ;;  %3083 = vmatprep.subr.bf16.mxu0 %v3513_v41 }
 0x278   : > { %3058 = vmatpush1.bf16.msra.mxu1 %v3987_v31  ;;  %3085 = vmatpush3.bf16.msra.mxu0 %v3993_v33 }
 0x279   : > { %3060 = vmatprep.subr.bf16.mxu1 %v3996_v34  ;;  %3086 = vmatprep.subr.bf16.mxu0 %v3513_v41 }
 0x27c   : > { %3062 = vmatpush1.bf16.msra.mxu1 %v3005_v43  ;;  %3088 = vmatpush3.bf16.msra.mxu0 %v3031_v45 }
 0x27d   : > { %3064 = vmatprep.subr.bf16.mxu1 %v3007_v47  ;;  %3089 = vmatprep.subr.bf16.mxu0 %v3513_v41 }
 0x280   : > { %3066 = vmatpush1.bf16.msra.mxu1 %v3009_v58  ;;  %3091 = vmatpush3.bf16.msra.mxu0 %v3034_v61  ;;  %v1558_v61 = vstv %s1557_s27 }
 0x281   : > { %3068 = vmatprep.subr.bf16.mxu1 %v3011_v62  ;;  %3092 = vmatprep.subr.bf16.mxu0 %v3513_v41  ;;  %vm4118_vm6 = vcmp.eq.s32.totalorder %v1558_v61, 1  ;;  %v1733_v61 = vstv %s1732_s0 }
 0x282   : > { %vm4150_vm7 = vcmp.eq.s32.totalorder %v1733_v61, 1 }
 0x284   : > { %3070 = vmatpush1.bf16.msra.mxu1 %v3013_v8  ;;  %3094 = vmatpush3.bf16.msra.mxu0 %v3037_v9 }
 0x285   : > { %2893 = vmatprep.subr.bf16.mxu0 %v3509_v1  ;;  %1916 = vmatprep.subr.bf16.mxu1 %v3307_v39 }
 0x31a   : > { %v1255_v12 = vpop.f32.mrb[8].mxu1  ;;  %v1296_v13 = vpop.f32.mrb[12].mxu0 }
 0x31b   : > { %v1256_v14 = vadd.f32 %v1255_v12, %v1081_v5  ;;  %v1257_v15 = vpop.f32.mrb[9].mxu1  ;;  %v2821_v16 = vpop.f32.mrb[13].mxu0  ;;  %v1297_v17 = vadd.f32 %v1296_v13, %v1089_v6  ;;  %v3311_v5 = vld [vmem:[#allocation8 + $0x1c] ss:$12 sps:$4 sm:$0xff]   ;;  %v3309_v6 = vld [vmem:[#allocation8 + $0x18] ss:$12 sps:$4 sm:$0xff]  }
 0x31c   : > { %v1258_v19 = vadd.f32 %v1257_v15, %v1085_v11  ;;  %v1259_v20 = vpop.f32.mrb[10].mxu1  ;;  %v1299_v21 = vpop.f32.mrb[14].mxu0  ;;  %v3315_v11 = vld [vmem:[#allocation8 + $0x34] ss:$12 sps:$4 sm:$0xff]   ;;  %v3313_v12 = vld [vmem:[#allocation8 + $0x30] ss:$12 sps:$4 sm:$0xff]  }
 0x31d   : > { %v1260_v22 = vpop.f32.mrb[11].mxu1  ;;  %v2822_v23 = vpop.f32.mrb[15].mxu0  ;;  %v1319_v25 = vrot.slane %v1297_v17, %v4095_v18  ;;  %v3319_v13 = vld [vmem:[#allocation8 + $0x4c] ss:$12 sps:$4 sm:$0xff]   ;;  %v3320_v15 = vld [vmem:[#allocation8 + $0x50] ss:$12 sps:$4 sm:$0xff]  }
 0x31e   : > { %v1305_v24 = vcombine.low %v1256_v14, %v1258_v19  ;;  %v3317_v14 = vld [vmem:[#allocation8 + $0x48] ss:$12 sps:$4 sm:$0xff]   ;;  %v3323_v16 = vld [vmem:[#allocation8 + $0x64] ss:$12 sps:$4 sm:$0xff]   ;;  %v3321_v17 = vld [vmem:[#allocation8 + $0x60] ss:$12 sps:$4 sm:$0xff]  }
 0x31f   : > { %v3324_v19 = vld [vmem:[#allocation8 + $0x68] ss:$12 sps:$4 sm:$0xff]   ;;  %v3325_v21 = vld [vmem:[#allocation8 + $0x78] ss:$12 sps:$4 sm:$0xff]   ;;  %v3328_v22 = vld [vmem:[#allocation8 + $0x80] ss:$12 sps:$4 sm:$0xff]  }
 0x320   : > { %v1312_v26 = vrot.slane %v1305_v24, %v4095_v18  ;;  %v3327_v20 = vld [vmem:[#allocation8 + $0x7c] ss:$12 sps:$4 sm:$0xff]   ;;  %v3331_v23 = vld [vmem:[#allocation8 + $0x94] ss:$12 sps:$4 sm:$0xff]  }
 0x321   : > { %v3329_v24 = vld [vmem:[#allocation8 + $0x90] ss:$12 sps:$4 sm:$0xff]  }
 0x322   : > { %v1320_v27 = vcombine.low %v1312_v26, %v1319_v25  ;;  %v3332_v25 = vld [vmem:[#allocation8 + $0x98] ss:$12 sps:$4 sm:$0xff]  }
 0x323   : > { %v3335_v26 = vld [vmem:[#allocation8 + $0xac] ss:$12 sps:$4 sm:$0xff]  }
 0x324   : > { %1322 = vst [vmem:[#allocation2] sm:$0x3f] %v1320_v27  ;;  %v2019_v27 = vld [vmem:[#allocation10 + $0x8] sm:$0xff] }
 0x32b   : > { %v1372_v32 = vld [vmem:[#allocation2] ss:$2 sm:$0x7] }
 0x32c   : > { %v1538_v38 = vrot.slane %v1372_v32, 1  ;;  %v1548_v54 = vrot.slane %v1372_v32, 2 }
 0x33a   : > { %v1455_v30 = vpop.f32.mrb[12].mxu1  ;;  %v1526_v31 = vpop.f32.mrb[16].mxu0 }
 0x33b   : > { %v1456_v33 = vadd.f32 %v1455_v30, %v4103_v29  ;;  %v1457_v34 = vpop.f32.mrb[13].mxu1  ;;  %v2857_v35 = vpop.f32.mrb[17].mxu0  ;;  %v1527_v51 = vadd.f32 %v1526_v31, %v4111_v48  ;;  %v2022_v30 = vld [vmem:[#allocation10 + $0x20] sm:$0xff]  ;;  %v3336_v31 = vld [vmem:[#allocation8 + $0xb0] ss:$12 sps:$4 sm:$0xff]  }
 0x33c   : > { %v1458_v36 = vadd.f32 %v1457_v34, %v4106_v4  ;;  %v1563_v35 = vld [vmem:[#allocation2 + $0x1] ss:$2 sm:$0x7] }
 0x33d   : > { %v1530_v37 = vadd.f32 %v1456_v33, %v1372_v32  ;;  %v4140_v32 = vpack.c.bf16 %v2022_v30, %v2019_v27  ;;  %v2033_v27 = vld [vmem:[#allocation10 + $0x78] sm:$0xff]  ;;  %v2035_v30 = vld [vmem:[#allocation10 + $0x88] sm:$0xff] }
 0x33e   : > { %v1540_v43 = vadd.f32 %v1538_v38, %v1458_v36 }
 0x33f   : > { %v2596_v42 = vmul.f32 -1.442695, %v1530_v37 }
 0x340   : > { %v2597_v44 = vmul.f32 -1.442695, %v1540_v43 }
 0x341   : > { %3345 = vpow2.f32 %v2596_v42 }
 0x342   : > { %3347 = vpow2.f32 %v2597_v44  ;;  %v1713_v44 = vrot.slane %v1563_v35, 1 }
 0x34b   : > { %v3346_v45 = vpop.eup %3345 }
 0x34c   : > { %v1534_v47 = vadd.f32 1.0, %v3346_v45  ;;  %v3348_v49 = vpop.eup %3347 }
 0x34d   : > { %v1544_v50 = vadd.f32 1.0, %v3348_v49 }
 0x34e   : > { %3349 = vrcp.f32 %v1534_v47 }
 0x34f   : > { %3351 = vrcp.f32 %v1544_v50 }
 0x358   : > { %v3350_v52 = vpop.eup %3349 }
 0x359   : > { %v1547_v53 = vmul.f32 %v3350_v52, %v1527_v51  ;;  %v3352_v58 = vpop.eup %3351 }
 0x35a   : > { %v1552_v60 = vsub.f32 1.0, %v3352_v58  ;;  %v1554_v0 = vmul.f32 0.0, %v3352_v58  ;;  %v1723_v58 = vrot.slane %v1563_v35, 2 }
 0x35b   : > { %v1550_v56 = vadd.f32 %v1548_v54, %v1547_v53 }
 0x35d   : > { %3353 = vtanh.f32 %v1550_v56 }
 0x367   : > { %v3354_v62 = vpop.eup %3353 }
 0x368   : > { %v1553_v63 = vmul.f32 %v3354_v62, %v1552_v60 }
 0x36a   : > { %v1555_v8 = vadd.f32 %v1554_v0, %v1553_v63 }
 0x36c   : > { %v4124_v9 = vsel %vm4118_vm6, %v1555_v8, 0.0  ;;  %2598 = vmatmul.mubr.msk.f32.vlgmr.msra.gmra.mrb[14].mxu1 %vm4118_vm6, %v1555_v8  ;;  %2891 = vmatmul.mubr.msk.f32.vlgmr.msra.gmra.mrb[18].mxu0 %vm4118_vm6, %v1555_v8 }
 0x36d   : > { %1561 = vst [vmem:[#allocation3] sm:$0x1] %v4124_v9  ;;  %1948 = vmatprep.mubr.bf16.mxu1 %v3512_v40  ;;  %2909 = vmatprep.mubr.msk.bf16.mxu0 %vm3510_vm0, %v3509_v1  ;;  %v3316_v40 = vld [vmem:[#allocation8 + $0x38] ss:$12 sps:$4 sm:$0xff]  }
 0x36e   : > { %1917 = vmatpush1.bf16.msra.mxu1 %v3305_v57  ;;  %2894 = vmatpush3.bf16.msra.mxu0 %v3308_v59  ;;  %v2018_v59 = vld [vmem:[#allocation10] sm:$0xff] }
 0x36f   : > { %2895 = vmatprep.subr.bf16.mxu0 %v3509_v1  ;;  %1918 = vmatprep.subr.bf16.mxu1 %v3311_v5  ;;  %v2021_v5 = vld [vmem:[#allocation10 + $0x18] sm:$0xff] }
 0x372   : > { %1919 = vmatpush1.bf16.msra.mxu1 %v3309_v6  ;;  %2896 = vmatpush3.bf16.msra.mxu0 %v3312_v10  ;;  %v2020_v6 = vld [vmem:[#allocation10 + $0x10] sm:$0xff]  ;;  %v2023_v10 = vld [vmem:[#allocation10 + $0x28] sm:$0xff] }
 0x373   : > { %2897 = vmatprep.subr.bf16.mxu0 %v3509_v1  ;;  %1920 = vmatprep.subr.bf16.mxu1 %v3315_v11  ;;  %v2025_v11 = vld [vmem:[#allocation10 + $0x38] sm:$0xff] }
 0x376   : > { %1921 = vmatpush1.bf16.msra.mxu1 %v3313_v12  ;;  %2898 = vmatpush3.bf16.msra.mxu0 %v3316_v40  ;;  %v2028_v12 = vld [vmem:[#allocation10 + $0x50] sm:$0xff] }
 0x377   : > { %2899 = vmatprep.subr.bf16.mxu0 %v3509_v1  ;;  %1922 = vmatprep.subr.bf16.mxu1 %v3319_v13  ;;  %v4157_v13 = vpack.c.bf16 %v2021_v5, %v2018_v59  ;;  %v2054_v59 = vld [vmem:[#allocation10 + $0x120] sm:$0xff] }
 0x37a   : > { %1923 = vmatpush1.bf16.msra.mxu1 %v3317_v14  ;;  %2900 = vmatpush3.bf16.msra.mxu0 %v3320_v15  ;;  %v2024_v14 = vld [vmem:[#allocation10 + $0x30] sm:$0xff]  ;;  %v4159_v15 = vpack.c.bf16 %v2023_v10, %v2020_v6  ;;  %v2057_v10 = vld [vmem:[#allocation10 + $0x138] sm:$0xff] }
 0x37b   : > { %2901 = vmatprep.subr.bf16.mxu0 %v3509_v1  ;;  %1924 = vmatprep.subr.bf16.mxu1 %v3323_v16 }
 0x37e   : > { %1925 = vmatpush1.bf16.msra.mxu1 %v3321_v17  ;;  %2902 = vmatpush3.bf16.msra.mxu0 %v3324_v19  ;;  %v4161_v17 = vpack.c.bf16 %v2028_v12, %v2025_v11  ;;  %v2027_v19 = vld [vmem:[#allocation10 + $0x48] sm:$0xff]  ;;  %v2056_v11 = vld [vmem:[#allocation10 + $0x130] sm:$0xff] }
 0x37f   : > { %2903 = vmatprep.subr.bf16.mxu0 %v3509_v1  ;;  %1926 = vmatprep.subr.bf16.mxu1 %v3327_v20  ;;  %v2026_v20 = vld [vmem:[#allocation10 + $0x40] sm:$0xff]  ;;  %v2059_v12 = vld [vmem:[#allocation10 + $0x148] sm:$0xff] }
 0x382   : > { %1927 = vmatpush1.bf16.msra.mxu1 %v3325_v21  ;;  %2904 = vmatpush3.bf16.msra.mxu0 %v3328_v22  ;;  %v2029_v21 = vld [vmem:[#allocation10 + $0x58] sm:$0xff]  ;;  %v2034_v22 = vld [vmem:[#allocation10 + $0x80] sm:$0xff] }
 0x383   : > { %2905 = vmatprep.subr.bf16.mxu0 %v3509_v1  ;;  %1928 = vmatprep.subr.bf16.mxu1 %v3331_v23  ;;  %v4164_v23 = vpack.c.bf16 %v2027_v19, %v2024_v14  ;;  %v2064_v14 = vld [vmem:[#allocation10 + $0x170] sm:$0xff] }
 0x384   : > { %v2060_v19 = vld [vmem:[#allocation10 + $0x150] sm:$0xff] }
 0x386   : > { %1929 = vmatpush1.bf16.msra.mxu1 %v3329_v24  ;;  %2906 = vmatpush3.bf16.msra.mxu0 %v3332_v25  ;;  %v2030_v24 = vld [vmem:[#allocation10 + $0x60] sm:$0xff]  ;;  %v4167_v25 = vpack.c.bf16 %v2029_v21, %v2026_v20  ;;  %v3146_v20 = vpack.c.bf16 %v2059_v12, %v2056_v11 }
 0x387   : > { %1930 = vmatprep.subr.bf16.mxu1 %v3335_v26  ;;  %2907 = vmatprep.subr.bf16.mxu0 %v3509_v1 }
 0x38a   : > { %1931 = vmatpush1.bf16.msra.mxu1 %v3333_v28  ;;  %2908 = vmatpush3.bf16.msra.mxu0 %v3336_v31  ;;  %v2032_v28 = vld [vmem:[#allocation10 + $0x70] sm:$0xff]  ;;  %v2037_v31 = vld [vmem:[#allocation10 + $0x98] sm:$0xff] }
 0x38b   : > { %3096 = vmatprep.subr.bf16.mxu1 %v4140_v32  ;;  %3127 = vmatprep.subr.bf16.mxu0 %v3513_v41 }
 0x43f   : > { %v1630_v33 = vpop.f32.mrb[14].mxu1  ;;  %v1701_v34 = vpop.f32.mrb[18].mxu0 }
 0x440   : > { %v1631_v36 = vadd.f32 %v1630_v33, %v4103_v29  ;;  %v1632_v37 = vpop.f32.mrb[15].mxu1  ;;  %v2892_v38 = vpop.f32.mrb[19].mxu0  ;;  %v1702_v54 = vadd.f32 %v1701_v34, %v4111_v48  ;;  %v2040_v33 = vld [vmem:[#allocation10 + $0xb0] sm:$0xff]  ;;  %v4177_v34 = vpack.c.bf16 %v2033_v27, %v2030_v24  ;;  %v2065_v24 = vld [vmem:[#allocation10 + $0x178] sm:$0xff] }
 0x441   : > { %v1633_v42 = vadd.f32 %v1632_v37, %v4106_v4  ;;  %v4183_v37 = vpack.c.bf16 %v2040_v33, %v2037_v31  ;;  %v2039_v38 = vld [vmem:[#allocation10 + $0xa8] sm:$0xff] }
 0x442   : > { %v1705_v43 = vadd.f32 %v1631_v36, %v1563_v35  ;;  %v2036_v35 = vld [vmem:[#allocation10 + $0x90] sm:$0xff]  ;;  %v4180_v36 = vpack.c.bf16 %v2035_v30, %v2032_v28 }
 0x443   : > { %v1715_v47 = vadd.f32 %v1713_v44, %v1633_v42  ;;  %v2038_v42 = vld [vmem:[#allocation10 + $0xa0] sm:$0xff]  ;;  %v2043_v44 = vld [vmem:[#allocation10 + $0xc8] sm:$0xff] }
 0x444   : > { %v2600_v45 = vmul.f32 -1.442695, %v1705_v43  ;;  %v2041_v43 = vld [vmem:[#allocation10 + $0xb8] sm:$0xff] }
 0x445   : > { %v2601_v49 = vmul.f32 -1.442695, %v1715_v47  ;;  %v4187_v47 = vpack.c.bf16 %v2039_v38, %v2036_v35 }
 0x446   : > { %3355 = vpow2.f32 %v2600_v45  ;;  %v2046_v45 = vld [vmem:[#allocation10 + $0xe0] sm:$0xff] }
 0x447   : > { %3357 = vpow2.f32 %v2601_v49  ;;  %v2042_v49 = vld [vmem:[#allocation10 + $0xc0] sm:$0xff] }
 0x450   : > { %v3356_v50 = vpop.eup %3355 }
 0x451   : > { %v1709_v51 = vadd.f32 1.0, %v3356_v50  ;;  %v3358_v52 = vpop.eup %3357  ;;  %v4190_v50 = vpack.c.bf16 %v2041_v43, %v2038_v42 }
 0x452   : > { %v1719_v53 = vadd.f32 1.0, %v3358_v52  ;;  %v2045_v52 = vld [vmem:[#allocation10 + $0xd8] sm:$0xff] }
 0x453   : > { %3359 = vrcp.f32 %v1709_v51  ;;  %v4193_v51 = vpack.c.bf16 %v2046_v45, %v2043_v44  ;;  %v2066_v44 = vld [vmem:[%s4304_s23] sm:$0x7] }
 0x454   : > { %3361 = vrcp.f32 %v1719_v53  ;;  %v2044_v53 = vld [vmem:[#allocation10 + $0xd0] sm:$0xff]  ;;  %v2072_v45 = vrot.slane %v2066_v44, %v3744_v7 }
 0x45d   : > { %v3360_v29 = vpop.eup %3359 }
 0x45e   : > { %v1722_v56 = vmul.f32 %v3360_v29, %v1702_v54  ;;  %v3362_v60 = vpop.eup %3361  ;;  %v2047_v54 = vld [vmem:[#allocation10 + $0xe8] sm:$0xff]  ;;  %v2049_v29 = vld [vmem:[#allocation10 + $0xf8] sm:$0xff] }
 0x45f   : > { %v1727_v62 = vsub.f32 1.0, %v3362_v60  ;;  %v1729_v8 = vmul.f32 %v3362_v60, %v4124_v9  ;;  %v4200_v60 = vpack.c.bf16 %v2047_v54, %v2044_v53 }
 0x460   : > { %v1725_v4 = vadd.f32 %v1723_v58, %v1722_v56  ;;  %v2052_v56 = vld [vmem:[#allocation10 + $0x110] sm:$0xff]  ;;  %v4197_v58 = vpack.c.bf16 %v2045_v52, %v2042_v49 }
 0x461   : > { %v3115_v61 = vpack.c.bf16 %v2052_v56, %v2049_v29 }
 0x462   : > { %3363 = vtanh.f32 %v1725_v4  ;;  %v2048_v4 = vld [vmem:[#allocation10 + $0xf0] sm:$0xff] }
 0x46c   : > { %v3364_v63 = vpop.eup %3363 }
 0x46d   : > { %v1728_v0 = vmul.f32 %v3364_v63, %v1727_v62  ;;  %v2051_v62 = vld [vmem:[#allocation10 + $0x108] sm:$0xff]  ;;  %v2050_v63 = vld [vmem:[#allocation10 + $0x100] sm:$0xff] }
 0x46f   : > { %v1730_v48 = vadd.f32 %v1729_v8, %v1728_v0  ;;  %v2053_v0 = vld [vmem:[#allocation10 + $0x118] sm:$0xff]  ;;  %v2055_v8 = vld [vmem:[#allocation10 + $0x128] sm:$0xff] }
 0x470   : > { %v3143_v5 = vpack.c.bf16 %v2053_v0, %v2050_v63 }
 0x471   : > { %v1735_v57 = vsel %vm4150_vm7, %v1730_v48, %v4124_v9  ;;  %v2031_v9 = vld [vmem:[#allocation10 + $0x68] sm:$0xff]  ;;  %v2058_v48 = vld [vmem:[#allocation10 + $0x140] sm:$0xff] }
 0x472   : > { %1736 = vst [vmem:[#allocation3 + $0x1] sm:$0x1] %v1735_v57  ;;  %v4170_v26 = vpack.c.bf16 %v2034_v22, %v2031_v9  ;;  %v3117_v57 = vpack.c.bf16 %v2051_v62, %v2048_v4  ;;  %v3119_v6 = vpack.c.bf16 %v2058_v48, %v2055_v8  ;;  %v2063_v9 = vld [vmem:[#allocation10 + $0x168] sm:$0xff]  ;;  %v2062_v22 = vld [vmem:[#allocation10 + $0x160] sm:$0xff] }
 0x473   : > { %v3125_v27 = vpack.c.bf16 %v2063_v9, %v2060_v19  ;;  %v3149_v28 = vpack.c.bf16 %v2065_v24, %v2062_v22 }
 0x479   : > { %v1737_v40 = vld [vmem:[#allocation3] sm:$0x3] }
 0x47a   : > { %v1738_v16 = vpack.c.bf16 %v1737_v40, %v1737_v40  ;;  %v2061_v40 = vld [vmem:[#allocation10 + $0x158] sm:$0xff] }
 0x47b   : > { %v3123_v21 = vpack.c.bf16 %v2064_v14, %v2061_v40 }
 0x47c   : > { %1949 = vmatmul.mubr.bf16.vlgmr.msra.gmra.mrb[16].mxu1 %v1738_v16  ;;  %2910 = vmatmul.mubr.bf16.vlgmr.msra.gmra.mrb[20].mxu0 %v1738_v16  ;;  %v3121_v16 = vpack.c.bf16 %v2057_v10, %v2054_v59 }
 0x47d   : > { %3098 = vmatpush1.bf16.msra.mxu1 %v4157_v13  ;;  %3129 = vmatpush3.bf16.msra.mxu0 %v4159_v15 }
 0x47e   : > { %3100 = vmatprep.subr.bf16.mxu1 %v4161_v17  ;;  %2148 = vmatprep.mubr.f32.mxu1 %v3509_v1 }
 0x47f   : > { %3130 = vmatprep.subr.bf16.mxu0 %v3513_v41  ;;  %2945 = vmatprep.mubr.msk.f32.mxu0 %vm3510_vm0, %v3509_v1 }
 0x481   : > { %3102 = vmatpush1.bf16.msra.mxu1 %v4164_v23  ;;  %3132 = vmatpush3.bf16.msra.mxu0 %v4167_v25 }
 0x482   : > { %3104 = vmatprep.subr.bf16.mxu1 %v4170_v26  ;;  %3133 = vmatprep.subr.bf16.mxu0 %v3513_v41 }
 0x485   : > { %3106 = vmatpush1.bf16.msra.mxu1 %v4177_v34  ;;  %3135 = vmatpush3.bf16.msra.mxu0 %v4180_v36 }
 0x486   : > { %3108 = vmatprep.subr.bf16.mxu1 %v4183_v37  ;;  %3136 = vmatprep.subr.bf16.mxu0 %v3513_v41 }
 0x489   : > { %3110 = vmatpush1.bf16.msra.mxu1 %v4187_v47  ;;  %3138 = vmatpush3.bf16.msra.mxu0 %v4190_v50 }
 0x48a   : > { %3112 = vmatprep.subr.bf16.mxu1 %v4193_v51  ;;  %3139 = vmatprep.subr.bf16.mxu0 %v3513_v41 }
 0x48d   : > { %3114 = vmatpush1.bf16.msra.mxu1 %v4197_v58  ;;  %3141 = vmatpush3.bf16.msra.mxu0 %v4200_v60 }
 0x48e   : > { %3116 = vmatprep.subr.bf16.mxu1 %v3115_v61  ;;  %3142 = vmatprep.subr.bf16.mxu0 %v3513_v41 }
 0x491   : > { %3118 = vmatpush1.bf16.msra.mxu1 %v3117_v57  ;;  %3144 = vmatpush3.bf16.msra.mxu0 %v3143_v5 }
 0x492   : > { %3120 = vmatprep.subr.bf16.mxu1 %v3119_v6  ;;  %3145 = vmatprep.subr.bf16.mxu0 %v3513_v41 }
 0x495   : > { %3122 = vmatpush1.bf16.msra.mxu1 %v3121_v16  ;;  %3147 = vmatpush3.bf16.msra.mxu0 %v3146_v20 }
 0x496   : > { %3124 = vmatprep.subr.bf16.mxu1 %v3123_v21  ;;  %3148 = vmatprep.subr.bf16.mxu0 %v3513_v41 }
 0x499   : > { %3126 = vmatpush1.bf16.msra.mxu1 %v3125_v27  ;;  %3150 = vmatpush3.bf16.msra.mxu0 %v3149_v28 }
 0x49a   : > { %3152 = vmatprep.subr.bf16.mxu1 %v4140_v32  ;;  %3183 = vmatprep.subr.bf16.mxu0 %v3513_v41 }
 0x49c   : > { %2149 = vmatmul.mubr.f32.vlgmr.msra.gmra.mrb[20].mxu1 %v3509_v1  ;;  %2946 = vmatmul.mubr.f32.vlgmr.msra.gmra.mrb[24].mxu0 %v3509_v1 }
 0x49d   : > { %3154 = vmatpush1.bf16.msra.mxu1 %v4157_v13  ;;  %3185 = vmatpush3.bf16.msra.mxu0 %v4159_v15 }
 0x49e   : > { %3156 = vmatprep.subr.bf16.mxu1 %v4161_v17  ;;  %3186 = vmatprep.subr.bf16.mxu0 %v3513_v41 }
 0x49f   : > { %2318 = vmatprep.mubr.f32.mxu1 %v3509_v1  ;;  %2980 = vmatprep.mubr.msk.f32.mxu0 %vm3510_vm0, %v3509_v1  ;;  %v1771_v1 = vld [vmem:[%s4285_s15] sm:$0x7] }
 0x4a0   : > { %v1776_v32 = vrot.slane %v1771_v1, %v3744_v7  ;;  %v1784_v13 = vrot.slane %v1771_v1, %v4086_v55  ;;  %v1780_v15 = vrot.slane %v1771_v1, %v4089_v2  ;;  %v2080_v7 = vrot.slane %v2066_v44, %v4086_v55 }
 0x4a1   : > { %3158 = vmatpush1.bf16.msra.mxu1 %v4164_v23  ;;  %3188 = vmatpush3.bf16.msra.mxu0 %v4167_v25 }
 0x4a2   : > { %3160 = vmatprep.subr.bf16.mxu1 %v4170_v26  ;;  %3189 = vmatprep.subr.bf16.mxu0 %v3513_v41 }
 0x4a5   : > { %3162 = vmatpush1.bf16.msra.mxu1 %v4177_v34  ;;  %3191 = vmatpush3.bf16.msra.mxu0 %v4180_v36 }
 0x4a6   : > { %3164 = vmatprep.subr.bf16.mxu1 %v4183_v37  ;;  %3192 = vmatprep.subr.bf16.mxu0 %v3513_v41 }
 0x4a9   : > { %3166 = vmatpush1.bf16.msra.mxu1 %v4187_v47  ;;  %3194 = vmatpush3.bf16.msra.mxu0 %v4190_v50  ;;  %v2076_v47 = vrot.slane %v2066_v44, %v4089_v2 }
 0x4aa   : > { %3168 = vmatprep.subr.bf16.mxu1 %v4193_v51  ;;  %3195 = vmatprep.subr.bf16.mxu0 %v3513_v41 }
 0x4ad   : > { %3170 = vmatpush1.bf16.msra.mxu1 %v4197_v58  ;;  %3197 = vmatpush3.bf16.msra.mxu0 %v4200_v60 }
 0x4ae   : > { %3172 = vmatprep.subr.bf16.mxu1 %v3115_v61  ;;  %3198 = vmatprep.subr.bf16.mxu0 %v3513_v41 }
 0x4b1   : > { %3174 = vmatpush1.bf16.msra.mxu1 %v3117_v57  ;;  %3200 = vmatpush3.bf16.msra.mxu0 %v3143_v5 }
 0x4b2   : > { %3176 = vmatprep.subr.bf16.mxu1 %v3119_v6  ;;  %3201 = vmatprep.subr.bf16.mxu0 %v3513_v41 }
 0x4b5   : > { %3178 = vmatpush1.bf16.msra.mxu1 %v3121_v16  ;;  %3203 = vmatpush3.bf16.msra.mxu0 %v3146_v20 }
 0x4b6   : > { %3180 = vmatprep.subr.bf16.mxu1 %v3123_v21  ;;  %3204 = vmatprep.subr.bf16.mxu0 %v3513_v41 }
 0x4b9   : > { %3182 = vmatpush1.bf16.msra.mxu1 %v3125_v27  ;;  %3206 = vmatpush3.bf16.msra.mxu0 %v3149_v28 }
 0x54f   : > { %v1950_v17 = vpop.f32.mrb[16].mxu1  ;;  %v1991_v23 = vpop.f32.mrb[20].mxu0 }
 0x550   : > { %v1951_v25 = vadd.f32 %v1950_v17, %v1776_v32  ;;  %v1952_v26 = vpop.f32.mrb[17].mxu1  ;;  %v2911_v30 = vpop.f32.mrb[21].mxu0  ;;  %v1992_v31 = vadd.f32 %v1991_v23, %v1784_v13 }
 0x551   : > { %v1953_v33 = vadd.f32 %v1952_v26, %v1780_v15  ;;  %v1954_v41 = vpop.f32.mrb[18].mxu1  ;;  %v1994_v34 = vpop.f32.mrb[22].mxu0 }
 0x552   : > { %v1955_v35 = vpop.f32.mrb[19].mxu1  ;;  %v2912_v36 = vpop.f32.mrb[23].mxu0  ;;  %v2014_v38 = vrot.slane %v1992_v31, %v4095_v18  ;;  %v637_v31 = vld [vmem:[%s4305_s16] sm:$0x1] }
 0x553   : > { %v2000_v37 = vcombine.low %v1951_v25, %v1953_v33  ;;  %v778_v41 = vadd.f32 %v4019_v46, %v637_v31 }
 0x555   : > { %v2007_v42 = vrot.slane %v2000_v37, %v4095_v18 }
 0x557   : > { %v2015_v43 = vcombine.low %v2007_v42, %v2014_v38 }
 0x559   : > { %2017 = vst [vmem:[#allocation2] sm:$0x3f] %v2015_v43 }
 0x560   : > { %v2067_v51 = vld [vmem:[#allocation2] ss:$2 sm:$0x7]  ;;  %v2253_v19 = vld [vmem:[#allocation2 + $0x1] ss:$2 sm:$0x7] }
 0x561   : > { %v2233_v58 = vrot.slane %v2067_v51, 1  ;;  %v2243_v57 = vrot.slane %v2067_v51, 2  ;;  %v2403_v27 = vrot.slane %v2253_v19, 1  ;;  %v2413_v30 = vrot.slane %v2253_v19, 2 }
 0x56f   : > { %v2150_v49 = vpop.f32.mrb[20].mxu1  ;;  %v2221_v50 = vpop.f32.mrb[24].mxu0 }
 0x570   : > { %v2151_v52 = vadd.f32 %v2150_v49, %v2072_v45  ;;  %v2152_v53 = vpop.f32.mrb[21].mxu1  ;;  %v2947_v54 = vpop.f32.mrb[25].mxu0  ;;  %v2222_v0 = vadd.f32 %v2221_v50, %v2080_v7 }
 0x571   : > { %v2153_v29 = vadd.f32 %v2152_v53, %v2076_v47 }
 0x572   : > { %v2225_v56 = vadd.f32 %v2151_v52, %v2067_v51 }
 0x573   : > { %v2235_v4 = vadd.f32 %v2233_v58, %v2153_v29 }
 0x574   : > { %v2626_v18 = vmul.f32 -1.442695, %v2225_v56 }
 0x575   : > { %v2627_v60 = vmul.f32 -1.442695, %v2235_v4 }
 0x576   : > { %3365 = vpow2.f32 %v2626_v18 }
 0x577   : > { %3367 = vpow2.f32 %v2627_v60 }
 0x580   : > { %v3366_v61 = vpop.eup %3365 }
 0x581   : > { %v2229_v62 = vadd.f32 1.0, %v3366_v61  ;;  %v3368_v2 = vpop.eup %3367 }
 0x582   : > { %v2239_v63 = vadd.f32 1.0, %v3368_v2 }
 0x583   : > { %3369 = vrcp.f32 %v2229_v62 }
 0x584   : > { %3371 = vrcp.f32 %v2239_v63 }
 0x58d   : > { %v3370_v8 = vpop.eup %3369 }
 0x58e   : > { %v2242_v48 = vmul.f32 %v3370_v8, %v2222_v0  ;;  %v3372_v5 = vpop.eup %3371 }
 0x58f   : > { %v2247_v6 = vsub.f32 1.0, %v3372_v5  ;;  %v2249_v12 = vmul.f32 0.0, %v3372_v5 }
 0x590   : > { %v2245_v59 = vadd.f32 %v2243_v57, %v2242_v48 }
 0x592   : > { %3373 = vtanh.f32 %v2245_v59 }
 0x59c   : > { %v3374_v10 = vpop.eup %3373 }
 0x59d   : > { %v2248_v11 = vmul.f32 %v3374_v10, %v2247_v6 }
 0x59f   : > { %v2250_v40 = vadd.f32 %v2249_v12, %v2248_v11 }
 0x5a1   : > { %v2251_v14 = vsel %vm4118_vm6, %v2250_v40, 0.0  ;;  %2628 = vmatmul.mubr.msk.f32.vlgmr.msra.gmra.mrb[22].mxu1 %vm4118_vm6, %v2250_v40  ;;  %2981 = vmatmul.mubr.msk.f32.vlgmr.msra.gmra.mrb[26].mxu0 %vm4118_vm6, %v2250_v40 }
 0x5a2   : > { %2252 = vst [vmem:[#allocation3] sm:$0x1] %v2251_v14 }
 0x674   : > { %v2320_v55 = vpop.f32.mrb[22].mxu1  ;;  %v2391_v16 = vpop.f32.mrb[26].mxu0 }
 0x675   : > { %v2321_v20 = vadd.f32 %v2320_v55, %v2072_v45  ;;  %v2322_v21 = vpop.f32.mrb[23].mxu1  ;;  %v2982_v9 = vpop.f32.mrb[27].mxu0  ;;  %v2392_v23 = vadd.f32 %v2391_v16, %v2080_v7 }
 0x676   : > { %v2323_v22 = vadd.f32 %v2322_v21, %v2076_v47 }
 0x677   : > { %v2395_v24 = vadd.f32 %v2321_v20, %v2253_v19 }
 0x678   : > { %v2405_v1 = vadd.f32 %v2403_v27, %v2323_v22 }
 0x679   : > { %v2630_v28 = vmul.f32 -1.442695, %v2395_v24 }
 0x67a   : > { %v2631_v32 = vmul.f32 -1.442695, %v2405_v1 }
 0x67b   : > { %3375 = vpow2.f32 %v2630_v28 }
 0x67c   : > { %3377 = vpow2.f32 %v2631_v32 }
 0x685   : > { %v3376_v13 = vpop.eup %3375 }
 0x686   : > { %v2399_v15 = vadd.f32 1.0, %v3376_v13  ;;  %v3378_v3 = vpop.eup %3377 }
 0x687   : > { %v2409_v17 = vadd.f32 1.0, %v3378_v3 }
 0x688   : > { %3379 = vrcp.f32 %v2399_v15 }
 0x689   : > { %3381 = vrcp.f32 %v2409_v17 }
 0x692   : > { %v3380_v25 = vpop.eup %3379 }
 0x693   : > { %v2412_v26 = vmul.f32 %v3380_v25, %v2392_v23  ;;  %v3382_v34 = vpop.eup %3381 }
 0x694   : > { %v2417_v35 = vsub.f32 1.0, %v3382_v34  ;;  %v2419_v38 = vmul.f32 %v3382_v34, %v2251_v14 }
 0x695   : > { %v2415_v33 = vadd.f32 %v2413_v30, %v2412_v26 }
 0x697   : > { %3383 = vtanh.f32 %v2415_v33 }
 0x698   : > { %3385 = vtanh.f32 %v778_v41 }
 0x6a1   : > { %v3384_v36 = vpop.eup %3383 }
 0x6a2   : > { %v2418_v37 = vmul.f32 %v3384_v36, %v2417_v35  ;;  %v3386_v43 = vpop.eup %3385 }
 0x6a4   : > { %v2420_v42 = vadd.f32 %v2419_v38, %v2418_v37 }
 0x6a6   : > { %v2421_v44 = vsel %vm4150_vm7, %v2420_v42, %v2251_v14 }
 0x6a7   : > { %2422 = vst [vmem:[#allocation3 + $0x1] sm:$0x1] %v2421_v44  ;;  %v2423_v45 = vadd.f32 %v3386_v43, %v2421_v44 }
 0x6a9   : > { %2424 = vst [vmem:[%s616_s17] sm:$0x1] %v2423_v45 }
 0x6aa PF: > { %s4307_s29 = sld [smem:[#allocation14_spill]] }
 0x6b0   : > { %s35_s29 = sadd.s32 1, %s4307_s29  }
 0x6b1   : > { %p32_p10 = scmp.ge.s32.totalorder %s35_s29, 5  }
 0x6b3   :  { %34 = sbr.rel (!%p32_p10) target bundleno = 24 (0x18), region = 137 }
 0x6ba   :  { %2442 = vsyncpa [#allocation7], 1 }
 0x6bb   :  { %2444 = vsyncpa [#allocation7 + $0x1], 1 }
 0x6bc   :  { %2445 = vsyncpa [#allocation9], 1 }

</bundles_post_ra>
